<compile_context>
chip_gen: v7x
topology: tpu7x:2x2x1
jax: 0.10.0
libtpu: 0.0.40
codegen_flags: <defaults>
</compile_context>

<pallas_src>
import jax
import jax.numpy as jnp
from jax.experimental import pallas as pl
from jax.experimental.pallas import tpu as pltpu


def _lstm_kernel(
    xproj_ref,            # (T, B, 4H) precomputed layer-0 gate slab (time-major)
    whh0_ref,             # (H, 4H)    layer-0 recurrent weights
    w1_ref, b1_ref,       # (2H, 4H), (1, 4H)  layer-1 fused weights / bias
    gamma_ref, beta_ref,  # (1, H)     layer norm
    wfc1_ref, bfc1_ref,   # (H, H//2), (1, H//2)
    wfc2_ref, bfc2_ref,   # (H//2, 1), (1, 1)
    out_ref,              # (B, 1)
):
    T, B, G = xproj_ref.shape
    H = G // 4

    whh0 = whh0_ref[...]
    w1 = w1_ref[...]
    b1 = b1_ref[...]

    # g-gate (tanh) occupies lanes [2H, 3H); i/f/o are sigmoid.  Activate the
    # whole (B, 4H) tile with a lane mask, then slice per gate.
    col = jax.lax.broadcasted_iota(jnp.int32, (B, G), 1)
    g_mask = (col >= 2 * H) & (col < 3 * H)

    def activate(gates):
        return jnp.where(g_mask, jnp.tanh(gates), jax.nn.sigmoid(gates))

    def combine(acts, c):
        i = acts[:, 0 * H:1 * H]
        f = acts[:, 1 * H:2 * H]
        g = acts[:, 2 * H:3 * H]
        o = acts[:, 3 * H:4 * H]
        c_new = f * c + i * g
        h_new = o * jnp.tanh(c_new)
        return h_new, c_new

    def step(t, carry):
        h1, c1, h2, c2 = carry
        # layer 0: input part precomputed; only the recurrent matmul remains.
        g0 = xproj_ref[t] + jnp.dot(h1, whh0, preferred_element_type=jnp.float32)
        h1, c1 = combine(activate(g0), c1)
        # layer 1: single fused [x, h] matmul (inter-layer dropout = identity).
        xh = jnp.concatenate([h1, h2], axis=-1)
        g1 = jnp.dot(xh, w1, preferred_element_type=jnp.float32) + b1
        h2, c2 = combine(activate(g1), c2)
        return h1, c1, h2, c2

    zeros = jnp.zeros((B, H), jnp.float32)
    _, _, h2, _ = jax.lax.fori_loop(
        0, T, step, (zeros, zeros, zeros, zeros), unroll=True)

    # LayerNorm on the last hidden state, then the FC head.
    mean = jnp.mean(h2, axis=-1, keepdims=True)
    var = jnp.mean((h2 - mean) ** 2, axis=-1, keepdims=True)
    normed = (h2 - mean) * jax.lax.rsqrt(var + 1e-5)
    normed = normed * gamma_ref[...] + beta_ref[...]
    hid = jnp.dot(normed, wfc1_ref[...], preferred_element_type=jnp.float32) + bfc1_ref[...]
    hid = jnp.maximum(hid, 0.0)       # ReLU (dropout = identity in eval)
    out = jnp.dot(hid, wfc2_ref[...], preferred_element_type=jnp.float32) + bfc2_ref[...]
    out_ref[...] = out.astype(out_ref.dtype)


def lstm_forward(x_btd, params):
    """x_btd: (B, T, D) batch-first, like the PyTorch module."""
    B, T, D = x_btd.shape
    H = params["W_hh0"].shape[1]

    # Hoist the layer-0 input projection out of the recurrence, fuse its two
    # biases, and emit the (T, B, 4H) time-major gate slab with a single XLA
    # contraction (no standalone HBM transpose of x is emitted).
    bias0 = (params["b_ih0"] + params["b_hh0"]).astype(jnp.float32)
    xproj = jnp.einsum(
        "btd,gd->tbg", x_btd, params["W_ih0"],
        preferred_element_type=jnp.float32) + bias0[None, None, :]

    kernel_args = [
        xproj,                                                       # (T, B, 4H)
        params["W_hh0"].T,                                           # (H, 4H)
        jnp.concatenate([params["W_ih1"].T, params["W_hh1"].T], 0),  # (2H, 4H)
        (params["b_ih1"] + params["b_hh1"])[None, :],                # (1, 4H)
        params["gamma"][None, :], params["beta"][None, :],           # (1, H)
        params["W_fc1"].T, params["b_fc1"][None, :],                 # (H, H/2), (1, H/2)
        params["W_fc2"].T, params["b_fc2"][None, :],                 # (H/2, 1), (1, 1)
    ]

    # No grid: everything fits as full VMEM blocks in a single invocation.
    return pl.pallas_call(
        _lstm_kernel,
        out_shape=jax.ShapeDtypeStruct((B, 1), jnp.float32),
        compiler_params=pltpu.CompilerParams(
            vmem_limit_bytes=32 * 1024 * 1024,
        ),
    )(*kernel_args)


def init_params(key, input_dim, hidden_size):
    H4 = 4 * hidden_size
    k = 1.0 / jnp.sqrt(hidden_size)
    keys = jax.random.split(key, 12)

    def u(kk, shape):
        return jax.random.uniform(kk, shape, jnp.float32, -k, k)

    return {
        "W_ih0": u(keys[0], (H4, input_dim)),
        "W_hh0": u(keys[1], (H4, hidden_size)),
        "b_ih0": u(keys[2], (H4,)),
        "b_hh0": u(keys[3], (H4,)),
        "W_ih1": u(keys[4], (H4, hidden_size)),
        "W_hh1": u(keys[5], (H4, hidden_size)),
        "b_ih1": u(keys[6], (H4,)),
        "b_hh1": u(keys[7], (H4,)),
        "gamma": jnp.ones((hidden_size,), jnp.float32),
        "beta": jnp.zeros((hidden_size,), jnp.float32),
        "W_fc1": u(keys[8], (hidden_size // 2, hidden_size)),
        "b_fc1": u(keys[9], (hidden_size // 2,)),
        "W_fc2": u(keys[10], (1, hidden_size // 2)),
        "b_fc2": u(keys[11], (1,)),
    }


def ref_forward(x, p):
    """Pure-JAX reference mirroring PyTorch nn.LSTM (eval mode)."""
    B, T, _ = x.shape
    H = p["W_hh0"].shape[1]

    def run_layer(inp, Wih, Whh, bih, bhh):
        h = jnp.zeros((B, H), jnp.float32)
        c = jnp.zeros((B, H), jnp.float32)
        outs = []
        for t in range(T):
            gates = inp[:, t, :] @ Wih.T + bih + h @ Whh.T + bhh
            i = jax.nn.sigmoid(gates[:, :H])
            f = jax.nn.sigmoid(gates[:, H:2 * H])
            g = jnp.tanh(gates[:, 2 * H:3 * H])
            o = jax.nn.sigmoid(gates[:, 3 * H:])
            c = f * c + i * g
            h = o * jnp.tanh(c)
            outs.append(h)
        return jnp.stack(outs, axis=1)

    out1 = run_layer(x, p["W_ih0"], p["W_hh0"], p["b_ih0"], p["b_hh0"])
    out2 = run_layer(out1, p["W_ih1"], p["W_hh1"], p["b_ih1"], p["b_hh1"])
    last = out2[:, -1, :]
    mean = last.mean(-1, keepdims=True)
    var = ((last - mean) ** 2).mean(-1, keepdims=True)
    normed = (last - mean) / jnp.sqrt(var + 1e-5) * p["gamma"] + p["beta"]
    hid = jnp.maximum(normed @ p["W_fc1"].T + p["b_fc1"], 0.0)
    return hid @ p["W_fc2"].T + p["b_fc2"]


if __name__ == "__main__":
    B, T, D, H = 2, 8, 8, 64  # batch, seq, input_dim, hidden_size (module default)

    key = jax.random.PRNGKey(0)
    kx, kp = jax.random.split(key)
    x = jax.random.normal(kx, (B, T, D), jnp.float32)
    params = init_params(kp, D, H)

    out = jax.block_until_ready(lstm_forward(x, params))

    ref = ref_forward(x, params)
    assert out.shape == (B, 1)
    assert jnp.allclose(out, ref, atol=1e-4, rtol=1e-4), (out, ref)

    print("KERNEL_OK")
</pallas_src>

<mosaic_0001>
module attributes {stable_mosaic.version = 11 : i64} {
  func.func @_lstm_kernel(%arg0: memref<8x2x256xf32, #tpu.memory_space<vmem>>, %arg1: memref<64x256xf32, #tpu.memory_space<vmem>>, %arg2: memref<128x256xf32, #tpu.memory_space<vmem>>, %arg3: memref<1x256xf32, #tpu.memory_space<vmem>>, %arg4: memref<1x64xf32, #tpu.memory_space<vmem>>, %arg5: memref<1x64xf32, #tpu.memory_space<vmem>>, %arg6: memref<64x32xf32, #tpu.memory_space<vmem>>, %arg7: memref<1x32xf32, #tpu.memory_space<vmem>>, %arg8: memref<32x1xf32, #tpu.memory_space<vmem>>, %arg9: memref<1x1xf32, #tpu.memory_space<vmem>>, %arg10: memref<2x1xf32, #tpu.memory_space<vmem>>) attributes {dimension_semantics = [], scalar_prefetch = 0 : i64, scratch_operands = 0 : i64, tpu.core_type = #tpu.core_type<tc>} {
    %c0 = arith.constant 0 : index
    %c0_0 = arith.constant 0 : index
    %0 = vector.load %arg1[%c0, %c0_0] : memref<64x256xf32, #tpu.memory_space<vmem>>, vector<64x256xf32>
    %c0_1 = arith.constant 0 : index
    %c0_2 = arith.constant 0 : index
    %1 = vector.load %arg2[%c0_1, %c0_2] : memref<128x256xf32, #tpu.memory_space<vmem>>, vector<128x256xf32>
    %c0_3 = arith.constant 0 : index
    %c0_4 = arith.constant 0 : index
    %2 = vector.load %arg3[%c0_3, %c0_4] : memref<1x256xf32, #tpu.memory_space<vmem>>, vector<1x256xf32>
    %3 = tpu.iota {dimensions = array<i32: 1>} : vector<2x256xi32>
    %c128_i32 = arith.constant 128 : i32
    %4 = vector.broadcast %c128_i32 : i32 to vector<2x256xi32>
    %5 = arith.cmpi sge, %3, %4 : vector<2x256xi32>
    %c192_i32 = arith.constant 192 : i32
    %6 = vector.broadcast %c192_i32 : i32 to vector<2x256xi32>
    %7 = arith.cmpi slt, %3, %6 : vector<2x256xi32>
    %8 = arith.andi %5, %7 : vector<2x256xi1>
    %cst = arith.constant 0.000000e+00 : f32
    %9 = vector.broadcast %cst : f32 to vector<2x64xf32>
    %c0_i32 = arith.constant 0 : i32
    %10 = arith.index_cast %c0_i32 : i32 to index
    %c0_5 = arith.constant 0 : index
    %c0_6 = arith.constant 0 : index
    %11 = vector.load %arg0[%10, %c0_5, %c0_6] : memref<8x2x256xf32, #tpu.memory_space<vmem>>, vector<1x2x256xf32>
    %12 = vector.shape_cast %11 : vector<1x2x256xf32> to vector<2x256xf32>
    %cst_7 = arith.constant dense<0.000000e+00> : vector<2x256xf32>
    %13 = tpu.matmul %9, %0, %cst_7 {dimension_numbers = #tpu.dot_dimension_numbers<[1], [0], [0], [1], [0, 0, 1, 1], [], []>} : vector<2x64xf32>, vector<64x256xf32>, vector<2x256xf32> -> vector<2x256xf32>
    %14 = arith.addf %12, %13 : vector<2x256xf32>
    %15 = math.tanh %14 : vector<2x256xf32>
    %16 = arith.negf %14 : vector<2x256xf32>
    %17 = math.exp %16 : vector<2x256xf32>
    %cst_8 = arith.constant 1.000000e+00 : f32
    %18 = vector.broadcast %cst_8 : f32 to vector<2x256xf32>
    %19 = arith.addf %18, %17 : vector<2x256xf32>
    %20 = arith.divf %18, %19 : vector<2x256xf32>
    %21 = arith.select %8, %15, %20 : vector<2x256xi1>, vector<2x256xf32>
    %22 = vector.extract_strided_slice %21 {offsets = [0, 0], sizes = [2, 64], strides = [1, 1]} : vector<2x256xf32> to vector<2x64xf32>
    %23 = vector.extract_strided_slice %21 {offsets = [0, 64], sizes = [2, 64], strides = [1, 1]} : vector<2x256xf32> to vector<2x64xf32>
    %24 = vector.extract_strided_slice %21 {offsets = [0, 128], sizes = [2, 64], strides = [1, 1]} : vector<2x256xf32> to vector<2x64xf32>
    %25 = vector.extract_strided_slice %21 {offsets = [0, 192], sizes = [2, 64], strides = [1, 1]} : vector<2x256xf32> to vector<2x64xf32>
    %26 = arith.mulf %23, %9 : vector<2x64xf32>
    %27 = arith.mulf %22, %24 : vector<2x64xf32>
    %28 = arith.addf %26, %27 : vector<2x64xf32>
    %29 = math.tanh %28 : vector<2x64xf32>
    %30 = arith.mulf %25, %29 : vector<2x64xf32>
    %31 = tpu.concatenate %30, %9 in 1 : vector<2x64xf32>, vector<2x64xf32> -> vector<2x128xf32>
    %cst_9 = arith.constant dense<0.000000e+00> : vector<2x256xf32>
    %32 = tpu.matmul %31, %1, %cst_9 {dimension_numbers = #tpu.dot_dimension_numbers<[1], [0], [0], [1], [0, 0, 1, 1], [], []>} : vector<2x128xf32>, vector<128x256xf32>, vector<2x256xf32> -> vector<2x256xf32>
    %33 = vector.broadcast %2 : vector<1x256xf32> to vector<2x256xf32>
    %34 = arith.addf %32, %33 : vector<2x256xf32>
    %35 = math.tanh %34 : vector<2x256xf32>
    %36 = arith.negf %34 : vector<2x256xf32>
    %37 = math.exp %36 : vector<2x256xf32>
    %cst_10 = arith.constant 1.000000e+00 : f32
    %38 = vector.broadcast %cst_10 : f32 to vector<2x256xf32>
    %39 = arith.addf %38, %37 : vector<2x256xf32>
    %40 = arith.divf %38, %39 : vector<2x256xf32>
    %41 = arith.select %8, %35, %40 : vector<2x256xi1>, vector<2x256xf32>
    %42 = vector.extract_strided_slice %41 {offsets = [0, 0], sizes = [2, 64], strides = [1, 1]} : vector<2x256xf32> to vector<2x64xf32>
    %43 = vector.extract_strided_slice %41 {offsets = [0, 64], sizes = [2, 64], strides = [1, 1]} : vector<2x256xf32> to vector<2x64xf32>
    %44 = vector.extract_strided_slice %41 {offsets = [0, 128], sizes = [2, 64], strides = [1, 1]} : vector<2x256xf32> to vector<2x64xf32>
    %45 = vector.extract_strided_slice %41 {offsets = [0, 192], sizes = [2, 64], strides = [1, 1]} : vector<2x256xf32> to vector<2x64xf32>
    %46 = arith.mulf %43, %9 : vector<2x64xf32>
    %47 = arith.mulf %42, %44 : vector<2x64xf32>
    %48 = arith.addf %46, %47 : vector<2x64xf32>
    %49 = math.tanh %48 : vector<2x64xf32>
    %50 = arith.mulf %45, %49 : vector<2x64xf32>
    %c1_i32 = arith.constant 1 : i32
    %51 = arith.index_cast %c1_i32 : i32 to index
    %c0_11 = arith.constant 0 : index
    %c0_12 = arith.constant 0 : index
    %52 = vector.load %arg0[%51, %c0_11, %c0_12] : memref<8x2x256xf32, #tpu.memory_space<vmem>>, vector<1x2x256xf32>
    %53 = vector.shape_cast %52 : vector<1x2x256xf32> to vector<2x256xf32>
    %cst_13 = arith.constant dense<0.000000e+00> : vector<2x256xf32>
    %54 = tpu.matmul %30, %0, %cst_13 {dimension_numbers = #tpu.dot_dimension_numbers<[1], [0], [0], [1], [0, 0, 1, 1], [], []>} : vector<2x64xf32>, vector<64x256xf32>, vector<2x256xf32> -> vector<2x256xf32>
    %55 = arith.addf %53, %54 : vector<2x256xf32>
    %56 = math.tanh %55 : vector<2x256xf32>
    %57 = arith.negf %55 : vector<2x256xf32>
    %58 = math.exp %57 : vector<2x256xf32>
    %cst_14 = arith.constant 1.000000e+00 : f32
    %59 = vector.broadcast %cst_14 : f32 to vector<2x256xf32>
    %60 = arith.addf %59, %58 : vector<2x256xf32>
    %61 = arith.divf %59, %60 : vector<2x256xf32>
    %62 = arith.select %8, %56, %61 : vector<2x256xi1>, vector<2x256xf32>
    %63 = vector.extract_strided_slice %62 {offsets = [0, 0], sizes = [2, 64], strides = [1, 1]} : vector<2x256xf32> to vector<2x64xf32>
    %64 = vector.extract_strided_slice %62 {offsets = [0, 64], sizes = [2, 64], strides = [1, 1]} : vector<2x256xf32> to vector<2x64xf32>
    %65 = vector.extract_strided_slice %62 {offsets = [0, 128], sizes = [2, 64], strides = [1, 1]} : vector<2x256xf32> to vector<2x64xf32>
    %66 = vector.extract_strided_slice %62 {offsets = [0, 192], sizes = [2, 64], strides = [1, 1]} : vector<2x256xf32> to vector<2x64xf32>
    %67 = arith.mulf %64, %28 : vector<2x64xf32>
    %68 = arith.mulf %63, %65 : vector<2x64xf32>
    %69 = arith.addf %67, %68 : vector<2x64xf32>
    %70 = math.tanh %69 : vector<2x64xf32>
    %71 = arith.mulf %66, %70 : vector<2x64xf32>
    %72 = tpu.concatenate %71, %50 in 1 : vector<2x64xf32>, vector<2x64xf32> -> vector<2x128xf32>
    %cst_15 = arith.constant dense<0.000000e+00> : vector<2x256xf32>
    %73 = tpu.matmul %72, %1, %cst_15 {dimension_numbers = #tpu.dot_dimension_numbers<[1], [0], [0], [1], [0, 0, 1, 1], [], []>} : vector<2x128xf32>, vector<128x256xf32>, vector<2x256xf32> -> vector<2x256xf32>
    %74 = vector.broadcast %2 : vector<1x256xf32> to vector<2x256xf32>
    %75 = arith.addf %73, %74 : vector<2x256xf32>
    %76 = math.tanh %75 : vector<2x256xf32>
    %77 = arith.negf %75 : vector<2x256xf32>
    %78 = math.exp %77 : vector<2x256xf32>
    %cst_16 = arith.constant 1.000000e+00 : f32
    %79 = vector.broadcast %cst_16 : f32 to vector<2x256xf32>
    %80 = arith.addf %79, %78 : vector<2x256xf32>
    %81 = arith.divf %79, %80 : vector<2x256xf32>
    %82 = arith.select %8, %76, %81 : vector<2x256xi1>, vector<2x256xf32>
    %83 = vector.extract_strided_slice %82 {offsets = [0, 0], sizes = [2, 64], strides = [1, 1]} : vector<2x256xf32> to vector<2x64xf32>
    %84 = vector.extract_strided_slice %82 {offsets = [0, 64], sizes = [2, 64], strides = [1, 1]} : vector<2x256xf32> to vector<2x64xf32>
    %85 = vector.extract_strided_slice %82 {offsets = [0, 128], sizes = [2, 64], strides = [1, 1]} : vector<2x256xf32> to vector<2x64xf32>
    %86 = vector.extract_strided_slice %82 {offsets = [0, 192], sizes = [2, 64], strides = [1, 1]} : vector<2x256xf32> to vector<2x64xf32>
    %87 = arith.mulf %84, %48 : vector<2x64xf32>
    %88 = arith.mulf %83, %85 : vector<2x64xf32>
    %89 = arith.addf %87, %88 : vector<2x64xf32>
    %90 = math.tanh %89 : vector<2x64xf32>
    %91 = arith.mulf %86, %90 : vector<2x64xf32>
    %c2_i32 = arith.constant 2 : i32
    %92 = arith.index_cast %c2_i32 : i32 to index
    %c0_17 = arith.constant 0 : index
    %c0_18 = arith.constant 0 : index
    %93 = vector.load %arg0[%92, %c0_17, %c0_18] : memref<8x2x256xf32, #tpu.memory_space<vmem>>, vector<1x2x256xf32>
    %94 = vector.shape_cast %93 : vector<1x2x256xf32> to vector<2x256xf32>
    %cst_19 = arith.constant dense<0.000000e+00> : vector<2x256xf32>
    %95 = tpu.matmul %71, %0, %cst_19 {dimension_numbers = #tpu.dot_dimension_numbers<[1], [0], [0], [1], [0, 0, 1, 1], [], []>} : vector<2x64xf32>, vector<64x256xf32>, vector<2x256xf32> -> vector<2x256xf32>
    %96 = arith.addf %94, %95 : vector<2x256xf32>
    %97 = math.tanh %96 : vector<2x256xf32>
    %98 = arith.negf %96 : vector<2x256xf32>
    %99 = math.exp %98 : vector<2x256xf32>
    %cst_20 = arith.constant 1.000000e+00 : f32
    %100 = vector.broadcast %cst_20 : f32 to vector<2x256xf32>
    %101 = arith.addf %100, %99 : vector<2x256xf32>
    %102 = arith.divf %100, %101 : vector<2x256xf32>
    %103 = arith.select %8, %97, %102 : vector<2x256xi1>, vector<2x256xf32>
    %104 = vector.extract_strided_slice %103 {offsets = [0, 0], sizes = [2, 64], strides = [1, 1]} : vector<2x256xf32> to vector<2x64xf32>
    %105 = vector.extract_strided_slice %103 {offsets = [0, 64], sizes = [2, 64], strides = [1, 1]} : vector<2x256xf32> to vector<2x64xf32>
    %106 = vector.extract_strided_slice %103 {offsets = [0, 128], sizes = [2, 64], strides = [1, 1]} : vector<2x256xf32> to vector<2x64xf32>
    %107 = vector.extract_strided_slice %103 {offsets = [0, 192], sizes = [2, 64], strides = [1, 1]} : vector<2x256xf32> to vector<2x64xf32>
    %108 = arith.mulf %105, %69 : vector<2x64xf32>
    %109 = arith.mulf %104, %106 : vector<2x64xf32>
    %110 = arith.addf %108, %109 : vector<2x64xf32>
    %111 = math.tanh %110 : vector<2x64xf32>
    %112 = arith.mulf %107, %111 : vector<2x64xf32>
    %113 = tpu.concatenate %112, %91 in 1 : vector<2x64xf32>, vector<2x64xf32> -> vector<2x128xf32>
    %cst_21 = arith.constant dense<0.000000e+00> : vector<2x256xf32>
    %114 = tpu.matmul %113, %1, %cst_21 {dimension_numbers = #tpu.dot_dimension_numbers<[1], [0], [0], [1], [0, 0, 1, 1], [], []>} : vector<2x128xf32>, vector<128x256xf32>, vector<2x256xf32> -> vector<2x256xf32>
    %115 = vector.broadcast %2 : vector<1x256xf32> to vector<2x256xf32>
    %116 = arith.addf %114, %115 : vector<2x256xf32>
    %117 = math.tanh %116 : vector<2x256xf32>
    %118 = arith.negf %116 : vector<2x256xf32>
    %119 = math.exp %118 : vector<2x256xf32>
    %cst_22 = arith.constant 1.000000e+00 : f32
    %120 = vector.broadcast %cst_22 : f32 to vector<2x256xf32>
    %121 = arith.addf %120, %119 : vector<2x256xf32>
    %122 = arith.divf %120, %121 : vector<2x256xf32>
    %123 = arith.select %8, %117, %122 : vector<2x256xi1>, vector<2x256xf32>
    %124 = vector.extract_strided_slice %123 {offsets = [0, 0], sizes = [2, 64], strides = [1, 1]} : vector<2x256xf32> to vector<2x64xf32>
    %125 = vector.extract_strided_slice %123 {offsets = [0, 64], sizes = [2, 64], strides = [1, 1]} : vector<2x256xf32> to vector<2x64xf32>
    %126 = vector.extract_strided_slice %123 {offsets = [0, 128], sizes = [2, 64], strides = [1, 1]} : vector<2x256xf32> to vector<2x64xf32>
    %127 = vector.extract_strided_slice %123 {offsets = [0, 192], sizes = [2, 64], strides = [1, 1]} : vector<2x256xf32> to vector<2x64xf32>
    %128 = arith.mulf %125, %89 : vector<2x64xf32>
    %129 = arith.mulf %124, %126 : vector<2x64xf32>
    %130 = arith.addf %128, %129 : vector<2x64xf32>
    %131 = math.tanh %130 : vector<2x64xf32>
    %132 = arith.mulf %127, %131 : vector<2x64xf32>
    %c3_i32 = arith.constant 3 : i32
    %133 = arith.index_cast %c3_i32 : i32 to index
    %c0_23 = arith.constant 0 : index
    %c0_24 = arith.constant 0 : index
    %134 = vector.load %arg0[%133, %c0_23, %c0_24] : memref<8x2x256xf32, #tpu.memory_space<vmem>>, vector<1x2x256xf32>
    %135 = vector.shape_cast %134 : vector<1x2x256xf32> to vector<2x256xf32>
    %cst_25 = arith.constant dense<0.000000e+00> : vector<2x256xf32>
    %136 = tpu.matmul %112, %0, %cst_25 {dimension_numbers = #tpu.dot_dimension_numbers<[1], [0], [0], [1], [0, 0, 1, 1], [], []>} : vector<2x64xf32>, vector<64x256xf32>, vector<2x256xf32> -> vector<2x256xf32>
    %137 = arith.addf %135, %136 : vector<2x256xf32>
    %138 = math.tanh %137 : vector<2x256xf32>
    %139 = arith.negf %137 : vector<2x256xf32>
    %140 = math.exp %139 : vector<2x256xf32>
    %cst_26 = arith.constant 1.000000e+00 : f32
    %141 = vector.broadcast %cst_26 : f32 to vector<2x256xf32>
    %142 = arith.addf %141, %140 : vector<2x256xf32>
    %143 = arith.divf %141, %142 : vector<2x256xf32>
    %144 = arith.select %8, %138, %143 : vector<2x256xi1>, vector<2x256xf32>
    %145 = vector.extract_strided_slice %144 {offsets = [0, 0], sizes = [2, 64], strides = [1, 1]} : vector<2x256xf32> to vector<2x64xf32>
    %146 = vector.extract_strided_slice %144 {offsets = [0, 64], sizes = [2, 64], strides = [1, 1]} : vector<2x256xf32> to vector<2x64xf32>
    %147 = vector.extract_strided_slice %144 {offsets = [0, 128], sizes = [2, 64], strides = [1, 1]} : vector<2x256xf32> to vector<2x64xf32>
    %148 = vector.extract_strided_slice %144 {offsets = [0, 192], sizes = [2, 64], strides = [1, 1]} : vector<2x256xf32> to vector<2x64xf32>
    %149 = arith.mulf %146, %110 : vector<2x64xf32>
    %150 = arith.mulf %145, %147 : vector<2x64xf32>
    %151 = arith.addf %149, %150 : vector<2x64xf32>
    %152 = math.tanh %151 : vector<2x64xf32>
    %153 = arith.mulf %148, %152 : vector<2x64xf32>
    %154 = tpu.concatenate %153, %132 in 1 : vector<2x64xf32>, vector<2x64xf32> -> vector<2x128xf32>
    %cst_27 = arith.constant dense<0.000000e+00> : vector<2x256xf32>
    %155 = tpu.matmul %154, %1, %cst_27 {dimension_numbers = #tpu.dot_dimension_numbers<[1], [0], [0], [1], [0, 0, 1, 1], [], []>} : vector<2x128xf32>, vector<128x256xf32>, vector<2x256xf32> -> vector<2x256xf32>
    %156 = vector.broadcast %2 : vector<1x256xf32> to vector<2x256xf32>
    %157 = arith.addf %155, %156 : vector<2x256xf32>
    %158 = math.tanh %157 : vector<2x256xf32>
    %159 = arith.negf %157 : vector<2x256xf32>
    %160 = math.exp %159 : vector<2x256xf32>
    %cst_28 = arith.constant 1.000000e+00 : f32
    %161 = vector.broadcast %cst_28 : f32 to vector<2x256xf32>
    %162 = arith.addf %161, %160 : vector<2x256xf32>
    %163 = arith.divf %161, %162 : vector<2x256xf32>
    %164 = arith.select %8, %158, %163 : vector<2x256xi1>, vector<2x256xf32>
    %165 = vector.extract_strided_slice %164 {offsets = [0, 0], sizes = [2, 64], strides = [1, 1]} : vector<2x256xf32> to vector<2x64xf32>
    %166 = vector.extract_strided_slice %164 {offsets = [0, 64], sizes = [2, 64], strides = [1, 1]} : vector<2x256xf32> to vector<2x64xf32>
    %167 = vector.extract_strided_slice %164 {offsets = [0, 128], sizes = [2, 64], strides = [1, 1]} : vector<2x256xf32> to vector<2x64xf32>
    %168 = vector.extract_strided_slice %164 {offsets = [0, 192], sizes = [2, 64], strides = [1, 1]} : vector<2x256xf32> to vector<2x64xf32>
    %169 = arith.mulf %166, %130 : vector<2x64xf32>
    %170 = arith.mulf %165, %167 : vector<2x64xf32>
    %171 = arith.addf %169, %170 : vector<2x64xf32>
    %172 = math.tanh %171 : vector<2x64xf32>
    %173 = arith.mulf %168, %172 : vector<2x64xf32>
    %c4_i32 = arith.constant 4 : i32
    %174 = arith.index_cast %c4_i32 : i32 to index
    %c0_29 = arith.constant 0 : index
    %c0_30 = arith.constant 0 : index
    %175 = vector.load %arg0[%174, %c0_29, %c0_30] : memref<8x2x256xf32, #tpu.memory_space<vmem>>, vector<1x2x256xf32>
    %176 = vector.shape_cast %175 : vector<1x2x256xf32> to vector<2x256xf32>
    %cst_31 = arith.constant dense<0.000000e+00> : vector<2x256xf32>
    %177 = tpu.matmul %153, %0, %cst_31 {dimension_numbers = #tpu.dot_dimension_numbers<[1], [0], [0], [1], [0, 0, 1, 1], [], []>} : vector<2x64xf32>, vector<64x256xf32>, vector<2x256xf32> -> vector<2x256xf32>
    %178 = arith.addf %176, %177 : vector<2x256xf32>
    %179 = math.tanh %178 : vector<2x256xf32>
    %180 = arith.negf %178 : vector<2x256xf32>
    %181 = math.exp %180 : vector<2x256xf32>
    %cst_32 = arith.constant 1.000000e+00 : f32
    %182 = vector.broadcast %cst_32 : f32 to vector<2x256xf32>
    %183 = arith.addf %182, %181 : vector<2x256xf32>
    %184 = arith.divf %182, %183 : vector<2x256xf32>
    %185 = arith.select %8, %179, %184 : vector<2x256xi1>, vector<2x256xf32>
    %186 = vector.extract_strided_slice %185 {offsets = [0, 0], sizes = [2, 64], strides = [1, 1]} : vector<2x256xf32> to vector<2x64xf32>
    %187 = vector.extract_strided_slice %185 {offsets = [0, 64], sizes = [2, 64], strides = [1, 1]} : vector<2x256xf32> to vector<2x64xf32>
    %188 = vector.extract_strided_slice %185 {offsets = [0, 128], sizes = [2, 64], strides = [1, 1]} : vector<2x256xf32> to vector<2x64xf32>
    %189 = vector.extract_strided_slice %185 {offsets = [0, 192], sizes = [2, 64], strides = [1, 1]} : vector<2x256xf32> to vector<2x64xf32>
    %190 = arith.mulf %187, %151 : vector<2x64xf32>
    %191 = arith.mulf %186, %188 : vector<2x64xf32>
    %192 = arith.addf %190, %191 : vector<2x64xf32>
    %193 = math.tanh %192 : vector<2x64xf32>
    %194 = arith.mulf %189, %193 : vector<2x64xf32>
    %195 = tpu.concatenate %194, %173 in 1 : vector<2x64xf32>, vector<2x64xf32> -> vector<2x128xf32>
    %cst_33 = arith.constant dense<0.000000e+00> : vector<2x256xf32>
    %196 = tpu.matmul %195, %1, %cst_33 {dimension_numbers = #tpu.dot_dimension_numbers<[1], [0], [0], [1], [0, 0, 1, 1], [], []>} : vector<2x128xf32>, vector<128x256xf32>, vector<2x256xf32> -> vector<2x256xf32>
    %197 = vector.broadcast %2 : vector<1x256xf32> to vector<2x256xf32>
    %198 = arith.addf %196, %197 : vector<2x256xf32>
    %199 = math.tanh %198 : vector<2x256xf32>
    %200 = arith.negf %198 : vector<2x256xf32>
    %201 = math.exp %200 : vector<2x256xf32>
    %cst_34 = arith.constant 1.000000e+00 : f32
    %202 = vector.broadcast %cst_34 : f32 to vector<2x256xf32>
    %203 = arith.addf %202, %201 : vector<2x256xf32>
    %204 = arith.divf %202, %203 : vector<2x256xf32>
    %205 = arith.select %8, %199, %204 : vector<2x256xi1>, vector<2x256xf32>
    %206 = vector.extract_strided_slice %205 {offsets = [0, 0], sizes = [2, 64], strides = [1, 1]} : vector<2x256xf32> to vector<2x64xf32>
    %207 = vector.extract_strided_slice %205 {offsets = [0, 64], sizes = [2, 64], strides = [1, 1]} : vector<2x256xf32> to vector<2x64xf32>
    %208 = vector.extract_strided_slice %205 {offsets = [0, 128], sizes = [2, 64], strides = [1, 1]} : vector<2x256xf32> to vector<2x64xf32>
    %209 = vector.extract_strided_slice %205 {offsets = [0, 192], sizes = [2, 64], strides = [1, 1]} : vector<2x256xf32> to vector<2x64xf32>
    %210 = arith.mulf %207, %171 : vector<2x64xf32>
    %211 = arith.mulf %206, %208 : vector<2x64xf32>
    %212 = arith.addf %210, %211 : vector<2x64xf32>
    %213 = math.tanh %212 : vector<2x64xf32>
    %214 = arith.mulf %209, %213 : vector<2x64xf32>
    %c5_i32 = arith.constant 5 : i32
    %215 = arith.index_cast %c5_i32 : i32 to index
    %c0_35 = arith.constant 0 : index
    %c0_36 = arith.constant 0 : index
    %216 = vector.load %arg0[%215, %c0_35, %c0_36] : memref<8x2x256xf32, #tpu.memory_space<vmem>>, vector<1x2x256xf32>
    %217 = vector.shape_cast %216 : vector<1x2x256xf32> to vector<2x256xf32>
    %cst_37 = arith.constant dense<0.000000e+00> : vector<2x256xf32>
    %218 = tpu.matmul %194, %0, %cst_37 {dimension_numbers = #tpu.dot_dimension_numbers<[1], [0], [0], [1], [0, 0, 1, 1], [], []>} : vector<2x64xf32>, vector<64x256xf32>, vector<2x256xf32> -> vector<2x256xf32>
    %219 = arith.addf %217, %218 : vector<2x256xf32>
    %220 = math.tanh %219 : vector<2x256xf32>
    %221 = arith.negf %219 : vector<2x256xf32>
    %222 = math.exp %221 : vector<2x256xf32>
    %cst_38 = arith.constant 1.000000e+00 : f32
    %223 = vector.broadcast %cst_38 : f32 to vector<2x256xf32>
    %224 = arith.addf %223, %222 : vector<2x256xf32>
    %225 = arith.divf %223, %224 : vector<2x256xf32>
    %226 = arith.select %8, %220, %225 : vector<2x256xi1>, vector<2x256xf32>
    %227 = vector.extract_strided_slice %226 {offsets = [0, 0], sizes = [2, 64], strides = [1, 1]} : vector<2x256xf32> to vector<2x64xf32>
    %228 = vector.extract_strided_slice %226 {offsets = [0, 64], sizes = [2, 64], strides = [1, 1]} : vector<2x256xf32> to vector<2x64xf32>
    %229 = vector.extract_strided_slice %226 {offsets = [0, 128], sizes = [2, 64], strides = [1, 1]} : vector<2x256xf32> to vector<2x64xf32>
    %230 = vector.extract_strided_slice %226 {offsets = [0, 192], sizes = [2, 64], strides = [1, 1]} : vector<2x256xf32> to vector<2x64xf32>
    %231 = arith.mulf %228, %192 : vector<2x64xf32>
    %232 = arith.mulf %227, %229 : vector<2x64xf32>
    %233 = arith.addf %231, %232 : vector<2x64xf32>
    %234 = math.tanh %233 : vector<2x64xf32>
    %235 = arith.mulf %230, %234 : vector<2x64xf32>
    %236 = tpu.concatenate %235, %214 in 1 : vector<2x64xf32>, vector<2x64xf32> -> vector<2x128xf32>
    %cst_39 = arith.constant dense<0.000000e+00> : vector<2x256xf32>
    %237 = tpu.matmul %236, %1, %cst_39 {dimension_numbers = #tpu.dot_dimension_numbers<[1], [0], [0], [1], [0, 0, 1, 1], [], []>} : vector<2x128xf32>, vector<128x256xf32>, vector<2x256xf32> -> vector<2x256xf32>
    %238 = vector.broadcast %2 : vector<1x256xf32> to vector<2x256xf32>
    %239 = arith.addf %237, %238 : vector<2x256xf32>
    %240 = math.tanh %239 : vector<2x256xf32>
    %241 = arith.negf %239 : vector<2x256xf32>
    %242 = math.exp %241 : vector<2x256xf32>
    %cst_40 = arith.constant 1.000000e+00 : f32
    %243 = vector.broadcast %cst_40 : f32 to vector<2x256xf32>
    %244 = arith.addf %243, %242 : vector<2x256xf32>
    %245 = arith.divf %243, %244 : vector<2x256xf32>
    %246 = arith.select %8, %240, %245 : vector<2x256xi1>, vector<2x256xf32>
    %247 = vector.extract_strided_slice %246 {offsets = [0, 0], sizes = [2, 64], strides = [1, 1]} : vector<2x256xf32> to vector<2x64xf32>
    %248 = vector.extract_strided_slice %246 {offsets = [0, 64], sizes = [2, 64], strides = [1, 1]} : vector<2x256xf32> to vector<2x64xf32>
    %249 = vector.extract_strided_slice %246 {offsets = [0, 128], sizes = [2, 64], strides = [1, 1]} : vector<2x256xf32> to vector<2x64xf32>
    %250 = vector.extract_strided_slice %246 {offsets = [0, 192], sizes = [2, 64], strides = [1, 1]} : vector<2x256xf32> to vector<2x64xf32>
    %251 = arith.mulf %248, %212 : vector<2x64xf32>
    %252 = arith.mulf %247, %249 : vector<2x64xf32>
    %253 = arith.addf %251, %252 : vector<2x64xf32>
    %254 = math.tanh %253 : vector<2x64xf32>
    %255 = arith.mulf %250, %254 : vector<2x64xf32>
    %c6_i32 = arith.constant 6 : i32
    %256 = arith.index_cast %c6_i32 : i32 to index
    %c0_41 = arith.constant 0 : index
    %c0_42 = arith.constant 0 : index
    %257 = vector.load %arg0[%256, %c0_41, %c0_42] : memref<8x2x256xf32, #tpu.memory_space<vmem>>, vector<1x2x256xf32>
    %258 = vector.shape_cast %257 : vector<1x2x256xf32> to vector<2x256xf32>
    %cst_43 = arith.constant dense<0.000000e+00> : vector<2x256xf32>
    %259 = tpu.matmul %235, %0, %cst_43 {dimension_numbers = #tpu.dot_dimension_numbers<[1], [0], [0], [1], [0, 0, 1, 1], [], []>} : vector<2x64xf32>, vector<64x256xf32>, vector<2x256xf32> -> vector<2x256xf32>
    %260 = arith.addf %258, %259 : vector<2x256xf32>
    %261 = math.tanh %260 : vector<2x256xf32>
    %262 = arith.negf %260 : vector<2x256xf32>
    %263 = math.exp %262 : vector<2x256xf32>
    %cst_44 = arith.constant 1.000000e+00 : f32
    %264 = vector.broadcast %cst_44 : f32 to vector<2x256xf32>
    %265 = arith.addf %264, %263 : vector<2x256xf32>
    %266 = arith.divf %264, %265 : vector<2x256xf32>
    %267 = arith.select %8, %261, %266 : vector<2x256xi1>, vector<2x256xf32>
    %268 = vector.extract_strided_slice %267 {offsets = [0, 0], sizes = [2, 64], strides = [1, 1]} : vector<2x256xf32> to vector<2x64xf32>
    %269 = vector.extract_strided_slice %267 {offsets = [0, 64], sizes = [2, 64], strides = [1, 1]} : vector<2x256xf32> to vector<2x64xf32>
    %270 = vector.extract_strided_slice %267 {offsets = [0, 128], sizes = [2, 64], strides = [1, 1]} : vector<2x256xf32> to vector<2x64xf32>
    %271 = vector.extract_strided_slice %267 {offsets = [0, 192], sizes = [2, 64], strides = [1, 1]} : vector<2x256xf32> to vector<2x64xf32>
    %272 = arith.mulf %269, %233 : vector<2x64xf32>
    %273 = arith.mulf %268, %270 : vector<2x64xf32>
    %274 = arith.addf %272, %273 : vector<2x64xf32>
    %275 = math.tanh %274 : vector<2x64xf32>
    %276 = arith.mulf %271, %275 : vector<2x64xf32>
    %277 = tpu.concatenate %276, %255 in 1 : vector<2x64xf32>, vector<2x64xf32> -> vector<2x128xf32>
    %cst_45 = arith.constant dense<0.000000e+00> : vector<2x256xf32>
    %278 = tpu.matmul %277, %1, %cst_45 {dimension_numbers = #tpu.dot_dimension_numbers<[1], [0], [0], [1], [0, 0, 1, 1], [], []>} : vector<2x128xf32>, vector<128x256xf32>, vector<2x256xf32> -> vector<2x256xf32>
    %279 = vector.broadcast %2 : vector<1x256xf32> to vector<2x256xf32>
    %280 = arith.addf %278, %279 : vector<2x256xf32>
    %281 = math.tanh %280 : vector<2x256xf32>
    %282 = arith.negf %280 : vector<2x256xf32>
    %283 = math.exp %282 : vector<2x256xf32>
    %cst_46 = arith.constant 1.000000e+00 : f32
    %284 = vector.broadcast %cst_46 : f32 to vector<2x256xf32>
    %285 = arith.addf %284, %283 : vector<2x256xf32>
    %286 = arith.divf %284, %285 : vector<2x256xf32>
    %287 = arith.select %8, %281, %286 : vector<2x256xi1>, vector<2x256xf32>
    %288 = vector.extract_strided_slice %287 {offsets = [0, 0], sizes = [2, 64], strides = [1, 1]} : vector<2x256xf32> to vector<2x64xf32>
    %289 = vector.extract_strided_slice %287 {offsets = [0, 64], sizes = [2, 64], strides = [1, 1]} : vector<2x256xf32> to vector<2x64xf32>
    %290 = vector.extract_strided_slice %287 {offsets = [0, 128], sizes = [2, 64], strides = [1, 1]} : vector<2x256xf32> to vector<2x64xf32>
    %291 = vector.extract_strided_slice %287 {offsets = [0, 192], sizes = [2, 64], strides = [1, 1]} : vector<2x256xf32> to vector<2x64xf32>
    %292 = arith.mulf %289, %253 : vector<2x64xf32>
    %293 = arith.mulf %288, %290 : vector<2x64xf32>
    %294 = arith.addf %292, %293 : vector<2x64xf32>
    %295 = math.tanh %294 : vector<2x64xf32>
    %296 = arith.mulf %291, %295 : vector<2x64xf32>
    %c7_i32 = arith.constant 7 : i32
    %297 = arith.index_cast %c7_i32 : i32 to index
    %c0_47 = arith.constant 0 : index
    %c0_48 = arith.constant 0 : index
    %298 = vector.load %arg0[%297, %c0_47, %c0_48] : memref<8x2x256xf32, #tpu.memory_space<vmem>>, vector<1x2x256xf32>
    %299 = vector.shape_cast %298 : vector<1x2x256xf32> to vector<2x256xf32>
    %cst_49 = arith.constant dense<0.000000e+00> : vector<2x256xf32>
    %300 = tpu.matmul %276, %0, %cst_49 {dimension_numbers = #tpu.dot_dimension_numbers<[1], [0], [0], [1], [0, 0, 1, 1], [], []>} : vector<2x64xf32>, vector<64x256xf32>, vector<2x256xf32> -> vector<2x256xf32>
    %301 = arith.addf %299, %300 : vector<2x256xf32>
    %302 = math.tanh %301 : vector<2x256xf32>
    %303 = arith.negf %301 : vector<2x256xf32>
    %304 = math.exp %303 : vector<2x256xf32>
    %cst_50 = arith.constant 1.000000e+00 : f32
    %305 = vector.broadcast %cst_50 : f32 to vector<2x256xf32>
    %306 = arith.addf %305, %304 : vector<2x256xf32>
    %307 = arith.divf %305, %306 : vector<2x256xf32>
    %308 = arith.select %8, %302, %307 : vector<2x256xi1>, vector<2x256xf32>
    %309 = vector.extract_strided_slice %308 {offsets = [0, 0], sizes = [2, 64], strides = [1, 1]} : vector<2x256xf32> to vector<2x64xf32>
    %310 = vector.extract_strided_slice %308 {offsets = [0, 64], sizes = [2, 64], strides = [1, 1]} : vector<2x256xf32> to vector<2x64xf32>
    %311 = vector.extract_strided_slice %308 {offsets = [0, 128], sizes = [2, 64], strides = [1, 1]} : vector<2x256xf32> to vector<2x64xf32>
    %312 = vector.extract_strided_slice %308 {offsets = [0, 192], sizes = [2, 64], strides = [1, 1]} : vector<2x256xf32> to vector<2x64xf32>
    %313 = arith.mulf %310, %274 : vector<2x64xf32>
    %314 = arith.mulf %309, %311 : vector<2x64xf32>
    %315 = arith.addf %313, %314 : vector<2x64xf32>
    %316 = math.tanh %315 : vector<2x64xf32>
    %317 = arith.mulf %312, %316 : vector<2x64xf32>
    %318 = tpu.concatenate %317, %296 in 1 : vector<2x64xf32>, vector<2x64xf32> -> vector<2x128xf32>
    %cst_51 = arith.constant dense<0.000000e+00> : vector<2x256xf32>
    %319 = tpu.matmul %318, %1, %cst_51 {dimension_numbers = #tpu.dot_dimension_numbers<[1], [0], [0], [1], [0, 0, 1, 1], [], []>} : vector<2x128xf32>, vector<128x256xf32>, vector<2x256xf32> -> vector<2x256xf32>
    %320 = vector.broadcast %2 : vector<1x256xf32> to vector<2x256xf32>
    %321 = arith.addf %319, %320 : vector<2x256xf32>
    %322 = math.tanh %321 : vector<2x256xf32>
    %323 = arith.negf %321 : vector<2x256xf32>
    %324 = math.exp %323 : vector<2x256xf32>
    %cst_52 = arith.constant 1.000000e+00 : f32
    %325 = vector.broadcast %cst_52 : f32 to vector<2x256xf32>
    %326 = arith.addf %325, %324 : vector<2x256xf32>
    %327 = arith.divf %325, %326 : vector<2x256xf32>
    %328 = arith.select %8, %322, %327 : vector<2x256xi1>, vector<2x256xf32>
    %329 = vector.extract_strided_slice %328 {offsets = [0, 0], sizes = [2, 64], strides = [1, 1]} : vector<2x256xf32> to vector<2x64xf32>
    %330 = vector.extract_strided_slice %328 {offsets = [0, 64], sizes = [2, 64], strides = [1, 1]} : vector<2x256xf32> to vector<2x64xf32>
    %331 = vector.extract_strided_slice %328 {offsets = [0, 128], sizes = [2, 64], strides = [1, 1]} : vector<2x256xf32> to vector<2x64xf32>
    %332 = vector.extract_strided_slice %328 {offsets = [0, 192], sizes = [2, 64], strides = [1, 1]} : vector<2x256xf32> to vector<2x64xf32>
    %333 = arith.mulf %330, %294 : vector<2x64xf32>
    %334 = arith.mulf %329, %331 : vector<2x64xf32>
    %335 = arith.addf %333, %334 : vector<2x64xf32>
    %336 = math.tanh %335 : vector<2x64xf32>
    %337 = arith.mulf %332, %336 : vector<2x64xf32>
    %c8_i32 = arith.constant 8 : i32
    %cst_53 = arith.constant dense<0.000000e+00> : vector<2xf32>
    %338 = vector.multi_reduction <add>, %337, %cst_53 [1] : vector<2x64xf32> to vector<2xf32>
    %339 = vector.shape_cast %338 : vector<2xf32> to vector<2x1xf32>
    %cst_54 = arith.constant 6.400000e+01 : f32
    %340 = vector.broadcast %cst_54 : f32 to vector<2x1xf32>
    %341 = arith.divf %339, %340 : vector<2x1xf32>
    %342 = vector.broadcast %341 : vector<2x1xf32> to vector<2x64xf32>
    %343 = arith.subf %337, %342 : vector<2x64xf32>
    %344 = arith.mulf %343, %343 : vector<2x64xf32>
    %cst_55 = arith.constant dense<0.000000e+00> : vector<2xf32>
    %345 = vector.multi_reduction <add>, %344, %cst_55 [1] : vector<2x64xf32> to vector<2xf32>
    %346 = vector.shape_cast %345 : vector<2xf32> to vector<2x1xf32>
    %cst_56 = arith.constant 6.400000e+01 : f32
    %347 = vector.broadcast %cst_56 : f32 to vector<2x1xf32>
    %348 = arith.divf %346, %347 : vector<2x1xf32>
    %349 = vector.broadcast %341 : vector<2x1xf32> to vector<2x64xf32>
    %350 = arith.subf %337, %349 : vector<2x64xf32>
    %cst_57 = arith.constant 9.99999974E-6 : f32
    %351 = vector.broadcast %cst_57 : f32 to vector<2x1xf32>
    %352 = arith.addf %348, %351 : vector<2x1xf32>
    %353 = math.rsqrt %352 : vector<2x1xf32>
    %354 = vector.broadcast %353 : vector<2x1xf32> to vector<2x64xf32>
    %355 = arith.mulf %350, %354 : vector<2x64xf32>
    %c0_58 = arith.constant 0 : index
    %c0_59 = arith.constant 0 : index
    %356 = vector.load %arg4[%c0_58, %c0_59] : memref<1x64xf32, #tpu.memory_space<vmem>>, vector<1x64xf32>
    %357 = vector.broadcast %356 : vector<1x64xf32> to vector<2x64xf32>
    %358 = arith.mulf %355, %357 : vector<2x64xf32>
    %c0_60 = arith.constant 0 : index
    %c0_61 = arith.constant 0 : index
    %359 = vector.load %arg5[%c0_60, %c0_61] : memref<1x64xf32, #tpu.memory_space<vmem>>, vector<1x64xf32>
    %360 = vector.broadcast %359 : vector<1x64xf32> to vector<2x64xf32>
    %361 = arith.addf %358, %360 : vector<2x64xf32>
    %c0_62 = arith.constant 0 : index
    %c0_63 = arith.constant 0 : index
    %362 = vector.load %arg6[%c0_62, %c0_63] : memref<64x32xf32, #tpu.memory_space<vmem>>, vector<64x32xf32>
    %cst_64 = arith.constant dense<0.000000e+00> : vector<2x32xf32>
    %363 = tpu.matmul %361, %362, %cst_64 {dimension_numbers = #tpu.dot_dimension_numbers<[1], [0], [0], [1], [0, 0, 1, 1], [], []>} : vector<2x64xf32>, vector<64x32xf32>, vector<2x32xf32> -> vector<2x32xf32>
    %c0_65 = arith.constant 0 : index
    %c0_66 = arith.constant 0 : index
    %364 = vector.load %arg7[%c0_65, %c0_66] : memref<1x32xf32, #tpu.memory_space<vmem>>, vector<1x32xf32>
    %365 = vector.broadcast %364 : vector<1x32xf32> to vector<2x32xf32>
    %366 = arith.addf %363, %365 : vector<2x32xf32>
    %cst_67 = arith.constant 0.000000e+00 : f32
    %367 = vector.broadcast %cst_67 : f32 to vector<2x32xf32>
    %368 = arith.maximumf %366, %367 : vector<2x32xf32>
    %c0_68 = arith.constant 0 : index
    %c0_69 = arith.constant 0 : index
    %369 = vector.load %arg8[%c0_68, %c0_69] : memref<32x1xf32, #tpu.memory_space<vmem>>, vector<32x1xf32>
    %cst_70 = arith.constant dense<0.000000e+00> : vector<2x1xf32>
    %370 = tpu.matmul %368, %369, %cst_70 {dimension_numbers = #tpu.dot_dimension_numbers<[1], [0], [0], [1], [0, 0, 1, 1], [], []>} : vector<2x32xf32>, vector<32x1xf32>, vector<2x1xf32> -> vector<2x1xf32>
    %c0_71 = arith.constant 0 : index
    %c0_72 = arith.constant 0 : index
    %371 = vector.load %arg9[%c0_71, %c0_72] : memref<1x1xf32, #tpu.memory_space<vmem>>, vector<1x1xf32>
    %372 = vector.broadcast %371 : vector<1x1xf32> to vector<2x1xf32>
    %373 = arith.addf %370, %372 : vector<2x1xf32>
    %c0_73 = arith.constant 0 : index
    %c0_74 = arith.constant 0 : index
    %374 = vector.load %arg10[%c0_73, %c0_74] : memref<2x1xf32, #tpu.memory_space<vmem>>, vector<2x1xf32>
    tpu.vector_store %arg10[%c0_73, %c0_74], %373 {strides = array<i32>} : memref<2x1xf32, #tpu.memory_space<vmem>>, vector<2x1xf32>,
    return
  }
}

</mosaic_0001>

<bundles_post_ra>
// kernel: tpu_custom_call.1
= control target key start
LH: loop header
LB: loop body
LE: loop exit
PB: predicated region body
PF: predicated region fallthrough
CT: control target
= control target key end

     0   :  { %s3537_s0 = inlined_call_operand.hbm [shape: f32[8,2,256], index: 0, kind: input, shape index: {}]   ;;  %s3538_s1 = inlined_call_operand.vmem [shape: f32[64,256], index: 1, kind: input, shape index: {}]   ;;  %s3539_s2 = inlined_call_operand.hbm [shape: f32[128,256], index: 2, kind: input, shape index: {}]   ;;  %s3540_s3 = inlined_call_operand.vmem [shape: f32[1,256], index: 3, kind: input, shape index: {}]   ;;  %s3541_s4 = inlined_call_operand.vmem [shape: f32[1,64], index: 4, kind: input, shape index: {}]   ;;  %s3542_s5 = inlined_call_operand.vmem [shape: f32[1,64], index: 5, kind: input, shape index: {}]   ;;  %s3543_s6 = inlined_call_operand.vmem [shape: f32[64,32], index: 6, kind: input, shape index: {}]   ;;  %s3544_s7 = inlined_call_operand.vmem [shape: f32[1,32], index: 7, kind: input, shape index: {}]   ;;  %s3545_s8 = inlined_call_operand.vmem [shape: f32[32,1], index: 8, kind: input, shape index: {}]   ;;  %s3546_s9 = inlined_call_operand.<no memory space> [shape: f32[1,1], index: 9, kind: input, shape index: {}]   ;;  %s3547_s10 = inlined_call_operand.vmem [shape: f32[2,1], index: 10, kind: output, shape index: {}]  }
   0x1   :  { %v15_v0 = vstv %s3546_s9 }
   0x2   :  { %16 = vst [vmem:[#allocation2] sm:$0x1] %v15_v0 }
   0x3   :  { %17 = vsyncpa [#allocation4], 0 }
   0x4   :  { %18 = vsyncpa [#allocation6], 0  ;;  %s2890_s15 = smov [#allocation3]   ;;  %s2842_s19 = scalar_lea.hbm %s3537_s0, 512 }
   0x5   :  { %s24_s16 = sshll.u32 %s2890_s15, 4  ;;  %p2843_p0 = scmp.ne.s32.totalorder %s3537_s0, %s2842_s19  ;;  %s25_s16 = int_to_ptr.vmem [resolvable:$true] %s24_s16 }
   0x6   :  { %p2846_p1 = scmp.lt.u32.totalorder %s2842_s19, %s3537_s0 }
   0x8   :  { %p2848_p2 = pnand %p2846_p1, %p2843_p0 }
   0xa   :  { %2851 = shalt.err (!%p2848_p2)
}
   0xb   :  { %s2852_s9 = scalar_lea.vmem %s25_s16, 512  ;;  %p2857_p4 = scmp.lt.s32.totalorder %s25_s16, %s25_s16 }
   0xc   :  { %p2853_p3 = scmp.ne.s32.totalorder %s25_s16, %s2852_s9  ;;  %p2858_p5 = scmp.lt.s32.totalorder %s2852_s9, %s2852_s9 }
   0xe   :  { %p2859_p6 = por %p2858_p5, %p2857_p4 }
  0x10   :  { %p2860_p7 = pnand %p2859_p6, %p2853_p3 }
  0x12   :  { %2863 = shalt.err (!%p2860_p7)
}
  0x13   :  { %s2891_s24 = smov 64   ;;  %s2892_s25 = smov 4  }
  0x14   :  { %30 = dma.hbm_to_vmem [thread:$0]  %s3537_s0, 512, %s25_s16, [#allocation4], %s2891_s24, %s2891_s24, %s2892_s25  }
  0x15   :  { %s2893_s28 = smov [#allocation5]   ;;  %s2864_s12 = scalar_lea.hbm %s3539_s2, 4096 }
  0x16   :  { %s38_s29 = sshll.u32 %s2893_s28, 4  ;;  %p2865_p8 = scmp.ne.s32.totalorder %s3539_s2, %s2864_s12  ;;  %s39_s29 = int_to_ptr.vmem [resolvable:$true] %s38_s29 }
  0x17   :  { %p2868_p9 = scmp.lt.u32.totalorder %s2864_s12, %s3539_s2 }
  0x19   :  { %p2870_p10 = pnand %p2868_p9, %p2865_p8 }
  0x1b   :  { %2873 = shalt.err (!%p2870_p10)
}
  0x1c   :  { %s2874_s18 = scalar_lea.vmem %s39_s29, 4096  ;;  %p2879_p12 = scmp.lt.s32.totalorder %s39_s29, %s39_s29 }
  0x1d   :  { %p2875_p11 = scmp.ne.s32.totalorder %s39_s29, %s2874_s18  ;;  %p2880_p13 = scmp.lt.s32.totalorder %s2874_s18, %s2874_s18 }
  0x1f   :  { %p2881_p0 = por %p2880_p13, %p2879_p12 }
  0x21   :  { %p2882_p1 = pnand %p2881_p0, %p2875_p11 }
  0x23   :  { %2885 = shalt.err (!%p2882_p1)
}
  0x24   :  { %s2894_s0 = smov 256   ;;  %s2895_s16 = smov 16  }
  0x25   :  { %44 = dma.hbm_to_vmem [thread:$0]  %s3539_s2, 4096, %s39_s29, [#allocation6], %s2894_s0, %s2894_s0, %s2895_s16  }
  0x26   :  { %2886 = dma.done.wait [#allocation4], 512  }
  0x27   :  { %2887 = vsyncadd [#allocation4], 4294966784 }
  0x28   :  { %2888 = dma.done.wait [#allocation6], 4096  }
  0x29   :  { %2889 = vsyncadd [#allocation6], 4294963200  ;;  %v2896_v1 = vmov 0.0   ;;  %v66_v2 = vld [vmem:[%s3538_s1 + $0x8] sm:$0xff]  ;;  %v68_v3 = vld [vmem:[%s3538_s1 + $0x18] sm:$0xff]  ;;  %v114_v26 = vlaneseq  ;;  %vm124_vm1 = vcmask 523264  }
  0x2a   :  { %192 = vmatprep.mubr.f32.mxu0 %v2896_v1  ;;  %331 = vmatprep.mubr.f32.mxu1 %v2896_v1  ;;  %v65_v4 = vld [vmem:[%s3538_s1] sm:$0xff]  ;;  %v2995_v5 = vpack.c.bf16 %v68_v3, %v66_v2  ;;  %v67_v6 = vld [vmem:[%s3538_s1 + $0x10] sm:$0xff]  ;;  %v70_v7 = vld [vmem:[%s3538_s1 + $0x28] sm:$0xff]  ;;  %v2897_v27 = vmov 1983009808   ;;  %vm1963_vm2 = vcmask 517120  }
  0x2b   :  { %v72_v8 = vld [vmem:[%s3538_s1 + $0x38] sm:$0xff]  ;;  %v3006_v9 = vpack.c.bf16 %v67_v6, %v65_v4  ;;  %v69_v11 = vld [vmem:[%s3538_s1 + $0x20] sm:$0xff]  ;;  %v71_v12 = vld [vmem:[%s3538_s1 + $0x30] sm:$0xff]  ;;  %v203_v28 = vunpack.c.l.s4 %v2897_v27  ;;  %v3068_v30 = vshrl.u32 %v114_v26, 7  ;;  %v115_v41 = vand.u32 127, %v114_v26 }
  0x2c   :  { %v3008_v10 = vpack.c.bf16 %v72_v8, %v70_v7  ;;  %v74_v13 = vld [vmem:[%s3538_s1 + $0x48] sm:$0xff]  ;;  %2269 = vmatprep.subr.bf16.mxu0 %v2995_v5  ;;  %v76_v14 = vld [vmem:[%s3538_s1 + $0x58] sm:$0xff]  ;;  %v3024_v15 = vpack.c.bf16 %v71_v12, %v69_v11  ;;  %v73_v17 = vld [vmem:[%s3538_s1 + $0x40] sm:$0xff]  ;;  %vm2899_vm3 = vmmov 0   ;;  %vm2104_vm4 = vcmask 261120  }
  0x2d   :  { %2271 = vmatpush1.bf16.msra.mxu0 %v3006_v9  ;;  %v3027_v16 = vpack.c.bf16 %v76_v14, %v74_v13  ;;  %v75_v18 = vld [vmem:[%s3538_s1 + $0x50] sm:$0xff]  ;;  %v78_v19 = vld [vmem:[%s3538_s1 + $0x68] sm:$0xff]  ;;  %v80_v20 = vld [vmem:[%s3538_s1 + $0x78] sm:$0xff]  ;;  %v204_v29 = vunpack.c.0.s8 %v203_v28  ;;  %v3074_v43 = vadd.s32 128, %v115_v41  ;;  %vm2178_vm5 = vcmask 1024  }
  0x2e   :  { %2273 = vmatprep.subr.bf16.mxu0 %v3008_v10  ;;  %v3042_v21 = vpack.c.bf16 %v75_v18, %v73_v17  ;;  %v3045_v22 = vpack.c.bf16 %v80_v20, %v78_v19  ;;  %v77_v23 = vld [vmem:[%s3538_s1 + $0x60] sm:$0xff]  ;;  %v79_v24 = vld [vmem:[%s3538_s1 + $0x70] sm:$0xff] }
  0x2f   :  { %v3054_v25 = vpack.c.bf16 %v79_v24, %v77_v23  ;;  %v3071_v32 = vsub.s32 %v204_v29, %v3068_v30  ;;  %v123_v35 = vld [vmem:[#allocation3] sm:$0xf]  ;;  %vm120_vm0 = vcmp.lt.s32.totalorder %v3074_v43, 192  ;;  %v82_v51 = vld [vmem:[#allocation5 + $0x8] sm:$0xff]  ;;  %v84_v52 = vld [vmem:[#allocation5 + $0x18] sm:$0xff] }
  0x30   :  { %v81_v53 = vld [vmem:[#allocation5] sm:$0xff]  ;;  %v3090_v54 = vpack.c.bf16 %v84_v52, %v82_v51  ;;  %v83_v55 = vld [vmem:[#allocation5 + $0x10] sm:$0xff]  ;;  %v86_v56 = vld [vmem:[#allocation5 + $0x28] sm:$0xff] }
  0x31   :  { %2275 = vmatpush1.bf16.msra.mxu0 %v3024_v15  ;;  %v88_v57 = vld [vmem:[#allocation5 + $0x38] sm:$0xff]  ;;  %v3092_v58 = vpack.c.bf16 %v83_v55, %v81_v53  ;;  %v85_v60 = vld [vmem:[#allocation5 + $0x20] sm:$0xff]  ;;  %v87_v61 = vld [vmem:[#allocation5 + $0x30] sm:$0xff] }
  0x32   :  { %2277 = vmatprep.subr.bf16.mxu0 %v3027_v16  ;;  %v3094_v59 = vpack.c.bf16 %v88_v57, %v86_v56  ;;  %v90_v62 = vld [vmem:[#allocation5 + $0x48] sm:$0xff]  ;;  %2285 = vmatprep.subr.bf16.mxu1 %v3090_v54  ;;  %v92_v63 = vld [vmem:[#allocation5 + $0x58] sm:$0xff]  ;;  %v3099_v0 = vpack.c.bf16 %v87_v61, %v85_v60  ;;  %v89_v3 = vld [vmem:[#allocation5 + $0x40] sm:$0xff] }
  0x33   :  { %2287 = vmatpush1.bf16.msra.mxu1 %v3092_v58  ;;  %v3102_v2 = vpack.c.bf16 %v92_v63, %v90_v62  ;;  %v91_v4 = vld [vmem:[#allocation5 + $0x50] sm:$0xff]  ;;  %v94_v6 = vld [vmem:[#allocation5 + $0x68] sm:$0xff]  ;;  %v96_v7 = vld [vmem:[#allocation5 + $0x78] sm:$0xff] }
  0x34   :  { %2289 = vmatprep.subr.bf16.mxu1 %v3094_v59  ;;  %v3105_v8 = vpack.c.bf16 %v91_v4, %v89_v3  ;;  %v3108_v11 = vpack.c.bf16 %v96_v7, %v94_v6  ;;  %v93_v12 = vld [vmem:[#allocation5 + $0x60] sm:$0xff]  ;;  %v95_v13 = vld [vmem:[#allocation5 + $0x70] sm:$0xff]  ;;  %v98_v14 = vld [vmem:[#allocation5 + $0x88] sm:$0xff] }
  0x35   :  { %2279 = vmatpush1.bf16.msra.mxu0 %v3042_v21  ;;  %v100_v17 = vld [vmem:[#allocation5 + $0x98] sm:$0xff]  ;;  %v3111_v18 = vpack.c.bf16 %v95_v13, %v93_v12  ;;  %v97_v20 = vld [vmem:[#allocation5 + $0x80] sm:$0xff]  ;;  %v99_v23 = vld [vmem:[#allocation5 + $0x90] sm:$0xff] }
  0x36   :  { %2281 = vmatprep.subr.bf16.mxu0 %v3045_v22  ;;  %v3114_v19 = vpack.c.bf16 %v100_v17, %v98_v14  ;;  %v102_v24 = vld [vmem:[#allocation5 + $0xa8] sm:$0xff]  ;;  %v104_v26 = vld [vmem:[#allocation5 + $0xb8] sm:$0xff]  ;;  %v3117_v27 = vpack.c.bf16 %v99_v23, %v97_v20  ;;  %v101_v29 = vld [vmem:[#allocation5 + $0xa0] sm:$0xff] }
  0x37   :  { %2291 = vmatpush1.bf16.msra.mxu1 %v3099_v0  ;;  %v3120_v28 = vpack.c.bf16 %v104_v26, %v102_v24  ;;  %v364_v61 = vld [vmem:[#allocation3 + $0x4] sm:$0xf]  ;;  %v263_v26 = vsub.s32 1, %v3068_v30  ;;  %v2218_v43 = vld [vmem:[%s3541_s4] ss:$0 sm:$0xff] }
  0x38   :  { %2293 = vmatprep.subr.bf16.mxu1 %v3102_v2 }
  0x39   :  { %2283 = vmatpush1.bf16.msra.mxu0 %v3054_v25 }
  0x3a   :  { %2317 = vmatprep.subr.bf16.mxu0 %v2995_v5 }
  0x3b   :  { %2295 = vmatpush1.bf16.msra.mxu1 %v3105_v8 }
  0x3c   :  { %193 = vmatmul.mubr.f32.vlgmr.msra.gmra.mrb[0].mxu0 %v2896_v1  ;;  %2297 = vmatprep.subr.bf16.mxu1 %v3108_v11 }
  0x3d   :  { %2319 = vmatpush1.bf16.msra.mxu0 %v3006_v9  ;;  %431 = vmatprep.mubr.f32.mxu0 %v2896_v1 }
  0x3e   :  { %2321 = vmatprep.subr.bf16.mxu0 %v3008_v10 }
  0x3f   :  { %2299 = vmatpush1.bf16.msra.mxu1 %v3111_v18 }
  0x40   :  { %2301 = vmatprep.subr.bf16.mxu1 %v3114_v19 }
  0x41   :  { %2323 = vmatpush1.bf16.msra.mxu0 %v3024_v15 }
  0x42   :  { %2325 = vmatprep.subr.bf16.mxu0 %v3027_v16 }
  0x43   :  { %2303 = vmatpush1.bf16.msra.mxu1 %v3117_v27 }
  0x44   :  { %2305 = vmatprep.subr.bf16.mxu1 %v3120_v28 }
  0x45   :  { %2327 = vmatpush1.bf16.msra.mxu0 %v3042_v21 }
  0x46   :  { %2329 = vmatprep.subr.bf16.mxu0 %v3045_v22 }
  0x49   :  { %2331 = vmatpush1.bf16.msra.mxu0 %v3054_v25 }
  0x4a   :  { %2333 = vmatprep.subr.bf16.mxu0 %v3090_v54 }
 0x10f   :  { %v194_v31 = vpop.f32.mrb[0].mxu0 }
 0x110   :  { %v196_v33 = vpop.f32.mrb[1].mxu0 }
 0x111   :  { %v201_v34 = vcombine.low %v194_v31, %v196_v33  ;;  %v103_v31 = vld [vmem:[#allocation5 + $0xb0] sm:$0xff]  ;;  %v106_v33 = vld [vmem:[#allocation5 + $0xc8] sm:$0xff] }
 0x113   :  { %v208_v36 = vrot.slane %v201_v34, %v3071_v32  ;;  %v108_v34 = vld [vmem:[#allocation5 + $0xd8] sm:$0xff] }
 0x115   :  { %v210_v37 = vadd.f32 %v208_v36, %v123_v35  ;;  %v3123_v35 = vpack.c.bf16 %v103_v31, %v101_v29  ;;  %v3126_v36 = vpack.c.bf16 %v108_v34, %v106_v33  ;;  %v113_v29 = vld [vmem:[%s3540_s3] sm:$0x3]  ;;  %v259_v33 = vsub.s32 0, %v3068_v30 }
 0x116   :  { %v3184_v31 = vrot.slane %v113_v29, %v263_v26 }
 0x117   :  { %v2186_v38 = vmul.f32 -1.442695, %v210_v37  ;;  %2307 = vmatpush1.bf16.msra.mxu1 %v3123_v35 }
 0x118   :  { %2309 = vmatprep.subr.bf16.mxu1 %v3126_v36 }
 0x119   :  { %2680 = vpow2.f32 %v2186_v38  ;;  %v107_v38 = vld [vmem:[#allocation5 + $0xd0] sm:$0xff] }
 0x11a   :  { %2682 = vtanh.f32 %v210_v37  ;;  %v105_v37 = vld [vmem:[#allocation5 + $0xc0] sm:$0xff] }
 0x11b   :  { %v3129_v41 = vpack.c.bf16 %v107_v38, %v105_v37  ;;  %v3188_v37 = vrot.slane %v113_v29, %v259_v33 }
 0x11d   :  { %2311 = vmatpush1.bf16.msra.mxu1 %v3129_v41 }
 0x123   :  { %v2681_v39 = vpop.eup %2680 }
 0x124   :  { %v215_v40 = vadd.f32 1.0, %v2681_v39  ;;  %v2683_v42 = vpop.eup %2682  ;;  %v110_v39 = vld [vmem:[#allocation5 + $0xe8] sm:$0xff] }
 0x125   :  { %v225_v44 = vrot.slane %v2683_v42, %v3071_v32 }
 0x126   :  { %2684 = vrcp.f32 %v215_v40  ;;  %v112_v40 = vld [vmem:[#allocation5 + $0xf8] sm:$0xff] }
 0x127   :  { %v226_v47 = vcombine.high %v225_v44, %v225_v44  ;;  %v3132_v42 = vpack.c.bf16 %v112_v40, %v110_v39  ;;  %v109_v44 = vld [vmem:[#allocation5 + $0xe0] sm:$0xff] }
 0x129   :  { %2313 = vmatprep.subr.bf16.mxu1 %v3132_v42 }
 0x130   :  { %v2685_v45 = vpop.eup %2684 }
 0x131   :  { %v3078_v46 = vrot.slane %v2685_v45, %v3071_v32  ;;  %v111_v45 = vld [vmem:[#allocation5 + $0xf0] sm:$0xff] }
 0x133   :  { %v237_v48 = vcombine.high %v3078_v46, %v3078_v46 }
 0x135   :  { %v3085_v49 = vsel %vm120_vm0, %v226_v47, %v237_v48  ;;  %v3135_v47 = vpack.c.bf16 %v111_v45, %v109_v44  ;;  %v242_v48 = vmul.f32 0.0, %v3078_v46 }
 0x136   :  { %v243_v50 = vmul.f32 %v3085_v49, %v3078_v46 }
 0x137   :  { %2315 = vmatpush1.bf16.msra.mxu1 %v3135_v47 }
 0x138   :  { %245 = vrot.lane.b32.xlu0 %v243_v50, %s2891_s24  ;;  %2365 = vmatprep.subr.bf16.mxu1 %v2995_v5 }
 0x1aa   :  { %v246_v50 = vpop.permute.xlu0 %245 }
 0x1ab   :  { %v3141_v51 = vadd.f32 %v246_v50, %v242_v48 }
 0x1ad   :  { %2686 = vtanh.f32 %v3141_v51 }
 0x1b7   :  { %v2687_v52 = vpop.eup %2686 }
 0x1b8   :  { %v250_v53 = vmul.f32 %v2687_v52, %v3085_v49 }
 0x1ba   :  { %252 = vrot.lane.b32.xlu0 %v250_v53, %s2891_s24 }
 0x22c   :  { %v253_v55 = vpop.permute.xlu0 %252 }
 0x22d   :  { %2187 = vmatmul.mubr.msk.f32.vlgmr.msra.gmra.mrb[0].mxu1 %vm124_vm1, %v253_v55  ;;  %2190 = vmatmul.mubr.msk.f32.vlgmr.msra.gmra.mrb[2].mxu0 %vm124_vm1, %v253_v55 }
 0x22e   :  { %2367 = vmatpush1.bf16.msra.mxu1 %v3006_v9  ;;  %2335 = vmatpush1.bf16.msra.mxu0 %v3092_v58 }
 0x22f   :  { %2369 = vmatprep.subr.bf16.mxu1 %v3008_v10  ;;  %2337 = vmatprep.subr.bf16.mxu0 %v3094_v59 }
 0x230   :  { %659 = vmatprep.mubr.f32.mxu1 %v2896_v1  ;;  %559 = vmatprep.mubr.f32.mxu0 %v2896_v1 }
 0x232   :  { %2371 = vmatpush1.bf16.msra.mxu1 %v3024_v15  ;;  %2339 = vmatpush1.bf16.msra.mxu0 %v3099_v0 }
 0x233   :  { %2373 = vmatprep.subr.bf16.mxu1 %v3027_v16  ;;  %2341 = vmatprep.subr.bf16.mxu0 %v3102_v2 }
 0x236   :  { %2375 = vmatpush1.bf16.msra.mxu1 %v3042_v21  ;;  %2343 = vmatpush1.bf16.msra.mxu0 %v3105_v8 }
 0x237   :  { %2377 = vmatprep.subr.bf16.mxu1 %v3045_v22  ;;  %2345 = vmatprep.subr.bf16.mxu0 %v3108_v11 }
 0x23a   :  { %2379 = vmatpush1.bf16.msra.mxu1 %v3054_v25  ;;  %2347 = vmatpush1.bf16.msra.mxu0 %v3111_v18 }
 0x23b   :  { %2349 = vmatprep.subr.bf16.mxu0 %v3114_v19  ;;  %2381 = vmatprep.subr.bf16.mxu1 %v3090_v54 }
 0x23e   :  { %2351 = vmatpush1.bf16.msra.mxu0 %v3117_v27 }
 0x23f   :  { %2353 = vmatprep.subr.bf16.mxu0 %v3120_v28 }
 0x242   :  { %2355 = vmatpush1.bf16.msra.mxu0 %v3123_v35 }
 0x243   :  { %2357 = vmatprep.subr.bf16.mxu0 %v3126_v36 }
 0x246   :  { %2359 = vmatpush1.bf16.msra.mxu0 %v3129_v41 }
 0x247   :  { %2361 = vmatprep.subr.bf16.mxu0 %v3132_v42 }
 0x24a   :  { %2363 = vmatpush1.bf16.msra.mxu0 %v3135_v47 }
 0x24b   :  { %2413 = vmatprep.subr.bf16.mxu0 %v2995_v5 }
 0x300   :  { %v333_v46 = vpop.f32.mrb[0].mxu1  ;;  %v433_v49 = vpop.f32.mrb[2].mxu0 }
 0x301   :  { %v335_v56 = vpop.f32.mrb[1].mxu1  ;;  %v435_v57 = vpop.f32.mrb[3].mxu0  ;;  %v334_v39 = vadd.f32 %v333_v46, %v3188_v37 }
 0x302   :  { %v440_v60 = vcombine.low %v433_v49, %v435_v57  ;;  %v336_v34 = vadd.f32 %v335_v56, %v3184_v31 }
 0x303   :  { %v2188_v40 = vmul.f32 -1.442695, %v334_v39 }
 0x304   :  { %v447_v62 = vrot.slane %v440_v60, %v3071_v32  ;;  %v2189_v38 = vmul.f32 -1.442695, %v336_v34 }
 0x306   :  { %v449_v63 = vadd.f32 %v447_v62, %v364_v61 }
 0x308   :  { %v2191_v3 = vmul.f32 -1.442695, %v449_v63 }
 0x30a   :  { %2688 = vpow2.f32 %v2191_v3 }
 0x30b   :  { %2690 = vtanh.f32 %v449_v63 }
 0x314   :  { %v2689_v4 = vpop.eup %2688 }
 0x315   :  { %v454_v6 = vadd.f32 1.0, %v2689_v4  ;;  %v2691_v7 = vpop.eup %2690 }
 0x316   :  { %v464_v12 = vrot.slane %v2691_v7, %v3071_v32 }
 0x317   :  { %2692 = vrcp.f32 %v454_v6 }
 0x318   :  { %v465_v17 = vcombine.high %v464_v12, %v464_v12  ;;  %2694 = vpow2.f32 %v2189_v38 }
 0x319   :  { %2696 = vpow2.f32 %v2188_v40 }
 0x321   :  { %v2693_v13 = vpop.eup %2692 }
 0x322   :  { %v475_v14 = vrot.slane %v2693_v13, %v3071_v32  ;;  %v2695_v44 = vpop.eup %2694 }
 0x323   :  { %v347_v45 = vadd.f32 1.0, %v2695_v44  ;;  %v2697_v50 = vpop.eup %2696 }
 0x324   :  { %v476_v20 = vcombine.high %v475_v14, %v475_v14  ;;  %v481_v48 = vmul.f32 %v475_v14, %v3141_v51  ;;  %v346_v30 = vadd.f32 1.0, %v2697_v50 }
 0x325   :  { %2698 = vrcp.f32 %v347_v45 }
 0x326   :  { %v480_v23 = vsel %vm120_vm0, %v465_v17, %v476_v20  ;;  %v592_v17 = vld [vmem:[#allocation3 + $0x8] sm:$0xf] }
 0x327   :  { %v482_v24 = vmul.f32 %v480_v23, %v475_v14 }
 0x329   :  { %484 = vrot.lane.b32.xlu1 %v482_v24, %s2891_s24 }
 0x32f   :  { %v2699_v55 = vpop.eup %2698 }
 0x39b   :  { %v485_v52 = vpop.permute.xlu1 %484 }
 0x39c   :  { %v3192_v53 = vadd.f32 %v485_v52, %v481_v48 }
 0x39e   :  { %2700 = vtanh.f32 %v3192_v53 }
 0x39f   :  { %2702 = vtanh.f32 %v336_v34 }
 0x3a0   :  { %2704 = vrcp.f32 %v346_v30 }
 0x3a8   :  { %v2701_v49 = vpop.eup %2700 }
 0x3a9   :  { %v2703_v46 = vpop.eup %2702  ;;  %v489_v56 = vmul.f32 %v2701_v49, %v480_v23 }
 0x3aa   :  { %v353_v57 = vsel %vm120_vm0, %v2703_v46, %v2699_v55  ;;  %v2705_v51 = vpop.eup %2704 }
 0x3ab   :  { %491 = vrot.lane.b32.xlu1 %v489_v56, %s2891_s24  ;;  %v355_v60 = vmul.f32 %v2705_v51, %v353_v57  ;;  %v354_v62 = vmul.f32 0.0, %v2705_v51 }
 0x3af   :  { %357 = vrot.lane.b32.xlu1 %v355_v60, %s2891_s24 }
 0x41d   :  { %v492_v61 = vpop.permute.xlu1 %491 }
 0x41e   :  { %2194 = vmatmul.mubr.msk.f32.vlgmr.msra.gmra.mrb[2].mxu1 %vm124_vm1, %v492_v61 }
 0x41f   :  { %2383 = vmatpush1.bf16.msra.mxu1 %v3092_v58  ;;  %787 = vmatprep.mubr.f32.mxu1 %v2896_v1 }
 0x420   :  { %2385 = vmatprep.subr.bf16.mxu1 %v3094_v59 }
 0x421   :  { %v358_v63 = vpop.permute.xlu1 %357 }
 0x422   :  { %v3203_v3 = vadd.f32 %v358_v63, %v354_v62 }
 0x423   :  { %2387 = vmatpush1.bf16.msra.mxu1 %v3099_v0 }
 0x424   :  { %2706 = vtanh.f32 %v3203_v3  ;;  %2389 = vmatprep.subr.bf16.mxu1 %v3102_v2 }
 0x427   :  { %2391 = vmatpush1.bf16.msra.mxu1 %v3105_v8 }
 0x428   :  { %2393 = vmatprep.subr.bf16.mxu1 %v3108_v11 }
 0x42b   :  { %2395 = vmatpush1.bf16.msra.mxu1 %v3111_v18 }
 0x42c   :  { %2397 = vmatprep.subr.bf16.mxu1 %v3114_v19 }
 0x42e   :  { %v2707_v4 = vpop.eup %2706 }
 0x42f   :  { %v362_v6 = vmul.f32 %v2707_v4, %v353_v57  ;;  %2399 = vmatpush1.bf16.msra.mxu1 %v3117_v27 }
 0x430   :  { %2401 = vmatprep.subr.bf16.mxu1 %v3120_v28 }
 0x431   :  { %v494_v7 = vsel %vm124_vm1, %v492_v61, %v362_v6 }
 0x432   :  { %560 = vmatmul.mubr.f32.vlgmr.msra.gmra.mrb[4].mxu0 %v494_v7 }
 0x433   :  { %2415 = vmatpush1.bf16.msra.mxu0 %v3006_v9  ;;  %2403 = vmatpush1.bf16.msra.mxu1 %v3123_v35 }
 0x434   :  { %2417 = vmatprep.subr.bf16.mxu0 %v3008_v10  ;;  %2405 = vmatprep.subr.bf16.mxu1 %v3126_v36 }
 0x435   :  { %887 = vmatprep.mubr.f32.mxu0 %v2896_v1 }
 0x437   :  { %2419 = vmatpush1.bf16.msra.mxu0 %v3024_v15  ;;  %2407 = vmatpush1.bf16.msra.mxu1 %v3129_v41 }
 0x438   :  { %2421 = vmatprep.subr.bf16.mxu0 %v3027_v16  ;;  %2409 = vmatprep.subr.bf16.mxu1 %v3132_v42 }
 0x43b   :  { %2423 = vmatpush1.bf16.msra.mxu0 %v3042_v21  ;;  %2411 = vmatpush1.bf16.msra.mxu1 %v3135_v47 }
 0x43c   :  { %2425 = vmatprep.subr.bf16.mxu0 %v3045_v22  ;;  %2461 = vmatprep.subr.bf16.mxu1 %v2995_v5 }
 0x43f   :  { %2427 = vmatpush1.bf16.msra.mxu0 %v3054_v25 }
 0x440   :  { %2429 = vmatprep.subr.bf16.mxu0 %v3090_v54 }
 0x4f1   :  { %v661_v12 = vpop.f32.mrb[2].mxu1 }
 0x4f2   :  { %v663_v13 = vpop.f32.mrb[3].mxu1 }
 0x4f3   :  { %v668_v14 = vcombine.low %v661_v12, %v663_v13 }
 0x4f5   :  { %v675_v20 = vrot.slane %v668_v14, %v3071_v32 }
 0x4f7   :  { %v677_v23 = vadd.f32 %v675_v20, %v592_v17 }
 0x4f9   :  { %v2195_v24 = vmul.f32 -1.442695, %v677_v23 }
 0x4fb   :  { %2708 = vpow2.f32 %v2195_v24 }
 0x4fc   :  { %2710 = vtanh.f32 %v677_v23 }
 0x505   :  { %v2709_v26 = vpop.eup %2708  ;;  %v561_v29 = vpop.f32.mrb[4].mxu0 }
 0x506   :  { %v682_v33 = vadd.f32 1.0, %v2709_v26  ;;  %v562_v34 = vadd.f32 %v561_v29, %v3188_v37  ;;  %v563_v38 = vpop.f32.mrb[5].mxu0  ;;  %v2711_v45 = vpop.eup %2710 }
 0x507   :  { %v564_v39 = vadd.f32 %v563_v38, %v3184_v31  ;;  %v692_v48 = vrot.slane %v2711_v45, %v3071_v32 }
 0x508   :  { %2712 = vrcp.f32 %v682_v33  ;;  %v2192_v40 = vmul.f32 -1.442695, %v562_v34 }
 0x509   :  { %v2193_v44 = vmul.f32 -1.442695, %v564_v39  ;;  %v693_v46 = vcombine.high %v692_v48, %v692_v48 }
 0x50a   :  { %2714 = vpow2.f32 %v2192_v40 }
 0x50b   :  { %2716 = vpow2.f32 %v2193_v44  ;;  %v820_v44 = vld [vmem:[#allocation3 + $0xc] sm:$0xf] }
 0x50c   :  { %2718 = vtanh.f32 %v564_v39 }
 0x512   :  { %v2713_v50 = vpop.eup %2712 }
 0x513   :  { %v703_v52 = vrot.slane %v2713_v50, %v3071_v32 }
 0x514   :  { %v2715_v30 = vpop.eup %2714 }
 0x515   :  { %v2717_v55 = vpop.eup %2716  ;;  %v574_v49 = vadd.f32 1.0, %v2715_v30  ;;  %v704_v56 = vcombine.high %v703_v52, %v703_v52  ;;  %v709_v7 = vmul.f32 %v703_v52, %v3192_v53 }
 0x516   :  { %v575_v57 = vadd.f32 1.0, %v2717_v55  ;;  %v2719_v61 = vpop.eup %2718 }
 0x517   :  { %v708_v51 = vsel %vm120_vm0, %v693_v46, %v704_v56 }
 0x518   :  { %2720 = vrcp.f32 %v575_v57  ;;  %v710_v60 = vmul.f32 %v708_v51, %v703_v52 }
 0x519   :  { %2722 = vrcp.f32 %v574_v49 }
 0x51a   :  { %712 = vrot.lane.b32.xlu0 %v710_v60, %s2891_s24 }
 0x522   :  { %v2721_v62 = vpop.eup %2720 }
 0x523   :  { %v2723_v63 = vpop.eup %2722  ;;  %v581_v4 = vsel %vm120_vm0, %v2719_v61, %v2721_v62 }
 0x524   :  { %v583_v6 = vmul.f32 %v2723_v63, %v581_v4  ;;  %v582_v23 = vmul.f32 %v2723_v63, %v3203_v3 }
 0x526   :  { %585 = vrot.lane.b32.xlu1 %v583_v6, %s2891_s24 }
 0x58c   :  { %v713_v12 = vpop.permute.xlu0 %712 }
 0x58d   :  { %v3242_v13 = vadd.f32 %v713_v12, %v709_v7 }
 0x58f   :  { %2724 = vtanh.f32 %v3242_v13 }
 0x598   :  { %v586_v20 = vpop.permute.xlu1 %585 }
 0x599   :  { %v2725_v14 = vpop.eup %2724  ;;  %v3247_v24 = vadd.f32 %v586_v20, %v582_v23 }
 0x59a   :  { %v717_v17 = vmul.f32 %v2725_v14, %v708_v51 }
 0x59b   :  { %2726 = vtanh.f32 %v3247_v24 }
 0x59c   :  { %719 = vrot.lane.b32.xlu0 %v717_v17, %s2891_s24 }
 0x5a5   :  { %v2727_v26 = vpop.eup %2726 }
 0x5a6   :  { %v590_v29 = vmul.f32 %v2727_v26, %v581_v4 }
 0x60e   :  { %v720_v33 = vpop.permute.xlu0 %719 }
 0x60f   :  { %v722_v53 = vsel %vm124_vm1, %v720_v33, %v590_v29  ;;  %2198 = vmatmul.mubr.msk.f32.vlgmr.msra.gmra.mrb[6].mxu0 %vm124_vm1, %v720_v33 }
 0x610   :  { %788 = vmatmul.mubr.f32.vlgmr.msra.gmra.mrb[4].mxu1 %v722_v53  ;;  %2431 = vmatpush1.bf16.msra.mxu0 %v3092_v58 }
 0x611   :  { %2433 = vmatprep.subr.bf16.mxu0 %v3094_v59  ;;  %2463 = vmatpush1.bf16.msra.mxu1 %v3006_v9 }
 0x612   :  { %2465 = vmatprep.subr.bf16.mxu1 %v3008_v10  ;;  %1115 = vmatprep.mubr.f32.mxu1 %v2896_v1 }
 0x613   :  { %1015 = vmatprep.mubr.f32.mxu0 %v2896_v1 }
 0x614   :  { %2435 = vmatpush1.bf16.msra.mxu0 %v3099_v0 }
 0x615   :  { %2437 = vmatprep.subr.bf16.mxu0 %v3102_v2  ;;  %2467 = vmatpush1.bf16.msra.mxu1 %v3024_v15 }
 0x616   :  { %2469 = vmatprep.subr.bf16.mxu1 %v3027_v16 }
 0x618   :  { %2439 = vmatpush1.bf16.msra.mxu0 %v3105_v8 }
 0x619   :  { %2441 = vmatprep.subr.bf16.mxu0 %v3108_v11  ;;  %2471 = vmatpush1.bf16.msra.mxu1 %v3042_v21 }
 0x61a   :  { %2473 = vmatprep.subr.bf16.mxu1 %v3045_v22 }
 0x61c   :  { %2443 = vmatpush1.bf16.msra.mxu0 %v3111_v18 }
 0x61d   :  { %2445 = vmatprep.subr.bf16.mxu0 %v3114_v19  ;;  %2475 = vmatpush1.bf16.msra.mxu1 %v3054_v25 }
 0x61e   :  { %2477 = vmatprep.subr.bf16.mxu1 %v3090_v54 }
 0x620   :  { %2447 = vmatpush1.bf16.msra.mxu0 %v3117_v27 }
 0x621   :  { %2449 = vmatprep.subr.bf16.mxu0 %v3120_v28 }
 0x624   :  { %2451 = vmatpush1.bf16.msra.mxu0 %v3123_v35 }
 0x625   :  { %2453 = vmatprep.subr.bf16.mxu0 %v3126_v36 }
 0x628   :  { %2455 = vmatpush1.bf16.msra.mxu0 %v3129_v41 }
 0x629   :  { %2457 = vmatprep.subr.bf16.mxu0 %v3132_v42 }
 0x62c   :  { %2459 = vmatpush1.bf16.msra.mxu0 %v3135_v47 }
 0x62d   :  { %2509 = vmatprep.subr.bf16.mxu0 %v2995_v5 }
 0x6e2   :  { %v889_v3 = vpop.f32.mrb[6].mxu0 }
 0x6e3   :  { %v789_v34 = vpop.f32.mrb[4].mxu1  ;;  %v891_v38 = vpop.f32.mrb[7].mxu0 }
 0x6e4   :  { %v896_v39 = vcombine.low %v889_v3, %v891_v38  ;;  %v791_v40 = vpop.f32.mrb[5].mxu1  ;;  %v790_v30 = vadd.f32 %v789_v34, %v3188_v37 }
 0x6e5   :  { %v792_v45 = vadd.f32 %v791_v40, %v3184_v31 }
 0x6e6   :  { %v903_v48 = vrot.slane %v896_v39, %v3071_v32  ;;  %v2196_v49 = vmul.f32 -1.442695, %v790_v30 }
 0x6e7   :  { %v2197_v50 = vmul.f32 -1.442695, %v792_v45 }
 0x6e8   :  { %v905_v52 = vadd.f32 %v903_v48, %v820_v44 }
 0x6e9   :  { %2728 = vpow2.f32 %v2197_v50 }
 0x6ea   :  { %v2199_v55 = vmul.f32 -1.442695, %v905_v52 }
 0x6ec   :  { %2730 = vpow2.f32 %v2199_v55 }
 0x6ed   :  { %2732 = vpow2.f32 %v2196_v49 }
 0x6ee   :  { %2734 = vtanh.f32 %v905_v52 }
 0x6f3   :  { %v2729_v46 = vpop.eup %2728 }
 0x6f4   :  { %v803_v51 = vadd.f32 1.0, %v2729_v46 }
 0x6f6   :  { %v2731_v56 = vpop.eup %2730 }
 0x6f7   :  { %v910_v57 = vadd.f32 1.0, %v2731_v56  ;;  %v2733_v60 = vpop.eup %2732  ;;  %v1048_v56 = vld [vmem:[#allocation3 + $0x10] sm:$0xf] }
 0x6f8   :  { %v802_v61 = vadd.f32 1.0, %v2733_v60  ;;  %v2735_v62 = vpop.eup %2734 }
 0x6f9   :  { %2736 = vrcp.f32 %v910_v57  ;;  %v920_v63 = vrot.slane %v2735_v62, %v3071_v32 }
 0x6fa   :  { %2738 = vrcp.f32 %v803_v51 }
 0x6fb   :  { %2740 = vtanh.f32 %v792_v45  ;;  %v921_v7 = vcombine.high %v920_v63, %v920_v63 }
 0x6fc   :  { %2742 = vrcp.f32 %v802_v61 }
 0x703   :  { %v2737_v4 = vpop.eup %2736 }
 0x704   :  { %v931_v6 = vrot.slane %v2737_v4, %v3071_v32  ;;  %v2739_v14 = vpop.eup %2738 }
 0x705   :  { %v2741_v20 = vpop.eup %2740 }
 0x706   :  { %v932_v12 = vcombine.high %v931_v6, %v931_v6  ;;  %v809_v26 = vsel %vm120_vm0, %v2741_v20, %v2739_v14  ;;  %v2743_v29 = vpop.eup %2742  ;;  %v937_v53 = vmul.f32 %v931_v6, %v3242_v13 }
 0x707   :  { %v811_v33 = vmul.f32 %v2743_v29, %v809_v26  ;;  %v810_v44 = vmul.f32 %v2743_v29, %v3247_v24 }
 0x708   :  { %v936_v17 = vsel %vm120_vm0, %v921_v7, %v932_v12 }
 0x709   :  { %v938_v23 = vmul.f32 %v936_v17, %v931_v6 }
 0x70b   :  { %940 = vrot.lane.b32.xlu0 %v938_v23, %s2891_s24 }
 0x70f   :  { %813 = vrot.lane.b32.xlu0 %v811_v33, %s2891_s24 }
 0x77d   :  { %v941_v3 = vpop.permute.xlu0 %940 }
 0x77e   :  { %v3290_v34 = vadd.f32 %v941_v3, %v937_v53 }
 0x780   :  { %2744 = vtanh.f32 %v3290_v34 }
 0x781   :  { %v814_v40 = vpop.permute.xlu0 %813 }
 0x782   :  { %v3295_v45 = vadd.f32 %v814_v40, %v810_v44 }
 0x784   :  { %2746 = vtanh.f32 %v3295_v45 }
 0x78a   :  { %v2745_v38 = vpop.eup %2744 }
 0x78b   :  { %v945_v39 = vmul.f32 %v2745_v38, %v936_v17 }
 0x78d   :  { %947 = vrot.lane.b32.xlu1 %v945_v39, %s2891_s24 }
 0x78e   :  { %v2747_v48 = vpop.eup %2746 }
 0x78f   :  { %v818_v50 = vmul.f32 %v2747_v48, %v809_v26 }
 0x7ff   :  { %v948_v52 = vpop.permute.xlu1 %947 }
 0x800   :  { %v950_v13 = vsel %vm124_vm1, %v948_v52, %v818_v50  ;;  %2202 = vmatmul.mubr.msk.f32.vlgmr.msra.gmra.mrb[6].mxu1 %vm124_vm1, %v948_v52 }
 0x801   :  { %1016 = vmatmul.mubr.f32.vlgmr.msra.gmra.mrb[8].mxu0 %v950_v13  ;;  %2479 = vmatpush1.bf16.msra.mxu1 %v3092_v58 }
 0x802   :  { %2481 = vmatprep.subr.bf16.mxu1 %v3094_v59  ;;  %2511 = vmatpush1.bf16.msra.mxu0 %v3006_v9 }
 0x803   :  { %2513 = vmatprep.subr.bf16.mxu0 %v3008_v10  ;;  %1343 = vmatprep.mubr.f32.mxu0 %v2896_v1 }
 0x804   :  { %1243 = vmatprep.mubr.f32.mxu1 %v2896_v1 }
 0x805   :  { %2483 = vmatpush1.bf16.msra.mxu1 %v3099_v0 }
 0x806   :  { %2485 = vmatprep.subr.bf16.mxu1 %v3102_v2  ;;  %2515 = vmatpush1.bf16.msra.mxu0 %v3024_v15 }
 0x807   :  { %2517 = vmatprep.subr.bf16.mxu0 %v3027_v16 }
 0x809   :  { %2487 = vmatpush1.bf16.msra.mxu1 %v3105_v8 }
 0x80a   :  { %2489 = vmatprep.subr.bf16.mxu1 %v3108_v11  ;;  %2519 = vmatpush1.bf16.msra.mxu0 %v3042_v21 }
 0x80b   :  { %2521 = vmatprep.subr.bf16.mxu0 %v3045_v22 }
 0x80d   :  { %2491 = vmatpush1.bf16.msra.mxu1 %v3111_v18 }
 0x80e   :  { %2493 = vmatprep.subr.bf16.mxu1 %v3114_v19  ;;  %2523 = vmatpush1.bf16.msra.mxu0 %v3054_v25 }
 0x80f   :  { %2525 = vmatprep.subr.bf16.mxu0 %v3090_v54 }
 0x811   :  { %2495 = vmatpush1.bf16.msra.mxu1 %v3117_v27 }
 0x812   :  { %2497 = vmatprep.subr.bf16.mxu1 %v3120_v28 }
 0x815   :  { %2499 = vmatpush1.bf16.msra.mxu1 %v3123_v35 }
 0x816   :  { %2501 = vmatprep.subr.bf16.mxu1 %v3126_v36 }
 0x819   :  { %2503 = vmatpush1.bf16.msra.mxu1 %v3129_v41 }
 0x81a   :  { %2505 = vmatprep.subr.bf16.mxu1 %v3132_v42 }
 0x81d   :  { %2507 = vmatpush1.bf16.msra.mxu1 %v3135_v47 }
 0x81e   :  { %2557 = vmatprep.subr.bf16.mxu1 %v2995_v5 }
 0x8d3   :  { %v1117_v24 = vpop.f32.mrb[6].mxu1 }
 0x8d4   :  { %v1017_v30 = vpop.f32.mrb[8].mxu0  ;;  %v1119_v55 = vpop.f32.mrb[7].mxu1 }
 0x8d5   :  { %v1124_v49 = vcombine.low %v1117_v24, %v1119_v55  ;;  %v1019_v46 = vpop.f32.mrb[9].mxu0  ;;  %v1018_v62 = vadd.f32 %v1017_v30, %v3188_v37 }
 0x8d6   :  { %v1020_v57 = vadd.f32 %v1019_v46, %v3184_v31 }
 0x8d7   :  { %v1131_v51 = vrot.slane %v1124_v49, %v3071_v32  ;;  %v2200_v4 = vmul.f32 -1.442695, %v1018_v62 }
 0x8d8   :  { %v2201_v60 = vmul.f32 -1.442695, %v1020_v57 }
 0x8d9   :  { %v1133_v61 = vadd.f32 %v1131_v51, %v1048_v56 }
 0x8da   :  { %2748 = vpow2.f32 %v2201_v60 }
 0x8db   :  { %v2203_v63 = vmul.f32 -1.442695, %v1133_v61 }
 0x8dd   :  { %2750 = vpow2.f32 %v2203_v63 }
 0x8de   :  { %2752 = vpow2.f32 %v2200_v4 }
 0x8df   :  { %2754 = vtanh.f32 %v1133_v61 }
 0x8e4   :  { %v2749_v6 = vpop.eup %2748 }
 0x8e5   :  { %v1031_v14 = vadd.f32 1.0, %v2749_v6 }
 0x8e7   :  { %v2751_v7 = vpop.eup %2750 }
 0x8e8   :  { %v1138_v12 = vadd.f32 1.0, %v2751_v7  ;;  %v2753_v17 = vpop.eup %2752  ;;  %v1276_v7 = vld [vmem:[#allocation3 + $0x14] sm:$0xf] }
 0x8e9   :  { %v1030_v20 = vadd.f32 1.0, %v2753_v17  ;;  %v2755_v23 = vpop.eup %2754 }
 0x8ea   :  { %2756 = vrcp.f32 %v1138_v12  ;;  %v1148_v26 = vrot.slane %v2755_v23, %v3071_v32 }
 0x8eb   :  { %2758 = vrcp.f32 %v1031_v14 }
 0x8ec   :  { %2760 = vtanh.f32 %v1020_v57  ;;  %v1149_v53 = vcombine.high %v1148_v26, %v1148_v26 }
 0x8ed   :  { %2762 = vrcp.f32 %v1030_v20 }
 0x8f4   :  { %v2757_v29 = vpop.eup %2756 }
 0x8f5   :  { %v1159_v33 = vrot.slane %v2757_v29, %v3071_v32  ;;  %v2759_v38 = vpop.eup %2758 }
 0x8f6   :  { %v2761_v40 = vpop.eup %2760 }
 0x8f7   :  { %v1160_v3 = vcombine.high %v1159_v33, %v1159_v33  ;;  %v1037_v48 = vsel %vm120_vm0, %v2761_v40, %v2759_v38  ;;  %v2763_v50 = vpop.eup %2762  ;;  %v1165_v13 = vmul.f32 %v1159_v33, %v3290_v34 }
 0x8f8   :  { %v1039_v52 = vmul.f32 %v2763_v50, %v1037_v48  ;;  %v1038_v56 = vmul.f32 %v2763_v50, %v3295_v45 }
 0x8f9   :  { %v1164_v39 = vsel %vm120_vm0, %v1149_v53, %v1160_v3 }
 0x8fa   :  { %v1166_v44 = vmul.f32 %v1164_v39, %v1159_v33 }
 0x8fc   :  { %1168 = vrot.lane.b32.xlu1 %v1166_v44, %s2891_s24 }
 0x900   :  { %1041 = vrot.lane.b32.xlu1 %v1039_v52, %s2891_s24 }
 0x96e   :  { %v1169_v24 = vpop.permute.xlu1 %1168 }
 0x96f   :  { %v3338_v30 = vadd.f32 %v1169_v24, %v1165_v13 }
 0x971   :  { %2764 = vtanh.f32 %v3338_v30 }
 0x972   :  { %v1042_v46 = vpop.permute.xlu1 %1041 }
 0x973   :  { %v3343_v57 = vadd.f32 %v1042_v46, %v1038_v56 }
 0x975   :  { %2766 = vtanh.f32 %v3343_v57 }
 0x97b   :  { %v2765_v55 = vpop.eup %2764 }
 0x97c   :  { %v1173_v49 = vmul.f32 %v2765_v55, %v1164_v39 }
 0x97e   :  { %1175 = vrot.lane.b32.xlu0 %v1173_v49, %s2891_s24 }
 0x97f   :  { %v2767_v51 = vpop.eup %2766 }
 0x980   :  { %v1046_v60 = vmul.f32 %v2767_v51, %v1037_v48 }
 0x9f0   :  { %v1176_v61 = vpop.permute.xlu0 %1175 }
 0x9f1   :  { %v1178_v34 = vsel %vm124_vm1, %v1176_v61, %v1046_v60  ;;  %2206 = vmatmul.mubr.msk.f32.vlgmr.msra.gmra.mrb[10].mxu0 %vm124_vm1, %v1176_v61 }
 0x9f2   :  { %1244 = vmatmul.mubr.f32.vlgmr.msra.gmra.mrb[8].mxu1 %v1178_v34  ;;  %2527 = vmatpush1.bf16.msra.mxu0 %v3092_v58 }
 0x9f3   :  { %2529 = vmatprep.subr.bf16.mxu0 %v3094_v59  ;;  %2559 = vmatpush1.bf16.msra.mxu1 %v3006_v9 }
 0x9f4   :  { %2561 = vmatprep.subr.bf16.mxu1 %v3008_v10  ;;  %1571 = vmatprep.mubr.f32.mxu1 %v2896_v1 }
 0x9f5   :  { %1471 = vmatprep.mubr.f32.mxu0 %v2896_v1 }
 0x9f6   :  { %2531 = vmatpush1.bf16.msra.mxu0 %v3099_v0 }
 0x9f7   :  { %2533 = vmatprep.subr.bf16.mxu0 %v3102_v2  ;;  %2563 = vmatpush1.bf16.msra.mxu1 %v3024_v15 }
 0x9f8   :  { %2565 = vmatprep.subr.bf16.mxu1 %v3027_v16 }
 0x9fa   :  { %2535 = vmatpush1.bf16.msra.mxu0 %v3105_v8 }
 0x9fb   :  { %2537 = vmatprep.subr.bf16.mxu0 %v3108_v11  ;;  %2567 = vmatpush1.bf16.msra.mxu1 %v3042_v21 }
 0x9fc   :  { %2569 = vmatprep.subr.bf16.mxu1 %v3045_v22 }
 0x9fe   :  { %2539 = vmatpush1.bf16.msra.mxu0 %v3111_v18 }
 0x9ff   :  { %2541 = vmatprep.subr.bf16.mxu0 %v3114_v19  ;;  %2571 = vmatpush1.bf16.msra.mxu1 %v3054_v25 }
 0xa00   :  { %2573 = vmatprep.subr.bf16.mxu1 %v3090_v54 }
 0xa02   :  { %2543 = vmatpush1.bf16.msra.mxu0 %v3117_v27 }
 0xa03   :  { %2545 = vmatprep.subr.bf16.mxu0 %v3120_v28 }
 0xa06   :  { %2547 = vmatpush1.bf16.msra.mxu0 %v3123_v35 }
 0xa07   :  { %2549 = vmatprep.subr.bf16.mxu0 %v3126_v36 }
 0xa0a   :  { %2551 = vmatpush1.bf16.msra.mxu0 %v3129_v41 }
 0xa0b   :  { %2553 = vmatprep.subr.bf16.mxu0 %v3132_v42 }
 0xa0e   :  { %2555 = vmatpush1.bf16.msra.mxu0 %v3135_v47 }
 0xa0f   :  { %2605 = vmatprep.subr.bf16.mxu0 %v2995_v5 }
 0xac4   :  { %v1345_v45 = vpop.f32.mrb[10].mxu0 }
 0xac5   :  { %v1245_v62 = vpop.f32.mrb[8].mxu1  ;;  %v1347_v63 = vpop.f32.mrb[11].mxu0 }
 0xac6   :  { %v1352_v4 = vcombine.low %v1345_v45, %v1347_v63  ;;  %v1247_v6 = vpop.f32.mrb[9].mxu1  ;;  %v1246_v23 = vadd.f32 %v1245_v62, %v3188_v37 }
 0xac7   :  { %v1248_v12 = vadd.f32 %v1247_v6, %v3184_v31 }
 0xac8   :  { %v1359_v14 = vrot.slane %v1352_v4, %v3071_v32  ;;  %v2204_v29 = vmul.f32 -1.442695, %v1246_v23 }
 0xac9   :  { %v2205_v17 = vmul.f32 -1.442695, %v1248_v12 }
 0xaca   :  { %v1361_v20 = vadd.f32 %v1359_v14, %v1276_v7 }
 0xacb   :  { %2768 = vpow2.f32 %v2205_v17 }
 0xacc   :  { %v2207_v26 = vmul.f32 -1.442695, %v1361_v20 }
 0xace   :  { %2770 = vpow2.f32 %v2207_v26 }
 0xacf   :  { %2772 = vpow2.f32 %v2204_v29 }
 0xad0   :  { %2774 = vtanh.f32 %v1361_v20 }
 0xad5   :  { %v2769_v5 = vpop.eup %2768 }
 0xad6   :  { %v1259_v3 = vadd.f32 1.0, %v2769_v5 }
 0xad8   :  { %v2771_v33 = vpop.eup %2770 }
 0xad9   :  { %v1366_v53 = vadd.f32 1.0, %v2771_v33  ;;  %v2773_v38 = vpop.eup %2772 }
 0xada   :  { %v1258_v39 = vadd.f32 1.0, %v2773_v38  ;;  %v2775_v40 = vpop.eup %2774 }
 0xadb   :  { %2776 = vrcp.f32 %v1366_v53  ;;  %v1376_v44 = vrot.slane %v2775_v40, %v3071_v32 }
 0xadc   :  { %2778 = vrcp.f32 %v1259_v3 }
 0xadd   :  { %2780 = vtanh.f32 %v1248_v12  ;;  %v1377_v52 = vcombine.high %v1376_v44, %v1376_v44 }
 0xade   :  { %2782 = vrcp.f32 %v1258_v39 }
 0xae5   :  { %v2777_v48 = vpop.eup %2776 }
 0xae6   :  { %v1387_v50 = vrot.slane %v2777_v48, %v3071_v32  ;;  %v2779_v24 = vpop.eup %2778 }
 0xae7   :  { %v2781_v49 = vpop.eup %2780 }
 0xae8   :  { %v1388_v13 = vcombine.high %v1387_v50, %v1387_v50  ;;  %v1265_v56 = vsel %vm120_vm0, %v2781_v49, %v2779_v24  ;;  %v2783_v51 = vpop.eup %2782  ;;  %v1393_v61 = vmul.f32 %v1387_v50, %v3338_v30 }
 0xae9   :  { %v1267_v60 = vmul.f32 %v2783_v51, %v1265_v56  ;;  %v1266_v6 = vmul.f32 %v2783_v51, %v3343_v57 }
 0xaea   :  { %v1392_v55 = vsel %vm120_vm0, %v1377_v52, %v1388_v13 }
 0xaeb   :  { %v1394_v46 = vmul.f32 %v1392_v55, %v1387_v50 }
 0xaed   :  { %1396 = vrot.lane.b32.xlu0 %v1394_v46, %s2891_s24 }
 0xaf1   :  { %1269 = vrot.lane.b32.xlu0 %v1267_v60, %s2891_s24 }
 0xb5f   :  { %v1397_v34 = vpop.permute.xlu0 %1396 }
 0xb60   :  { %v3386_v45 = vadd.f32 %v1397_v34, %v1393_v61 }
 0xb62   :  { %2784 = vtanh.f32 %v3386_v45 }
 0xb63   :  { %v1270_v4 = vpop.permute.xlu0 %1269 }
 0xb64   :  { %v3391_v7 = vadd.f32 %v1270_v4, %v1266_v6 }
 0xb66   :  { %2786 = vtanh.f32 %v3391_v7 }
 0xb6c   :  { %v2785_v62 = vpop.eup %2784 }
 0xb6d   :  { %v1401_v63 = vmul.f32 %v2785_v62, %v1392_v55 }
 0xb6f   :  { %1403 = vrot.lane.b32.xlu1 %v1401_v63, %s2891_s24 }
 0xb70   :  { %v2787_v12 = vpop.eup %2786 }
 0xb71   :  { %v1274_v14 = vmul.f32 %v2787_v12, %v1265_v56 }
 0xbe1   :  { %v1404_v17 = vpop.permute.xlu1 %1403 }
 0xbe2   :  { %v1406_v30 = vsel %vm124_vm1, %v1404_v17, %v1274_v14  ;;  %2210 = vmatmul.mubr.msk.f32.vlgmr.msra.gmra.mrb[10].mxu1 %vm124_vm1, %v1404_v17 }
 0xbe3   :  { %1472 = vmatmul.mubr.f32.vlgmr.msra.gmra.mrb[12].mxu0 %v1406_v30  ;;  %2575 = vmatpush1.bf16.msra.mxu1 %v3092_v58 }
 0xbe4   :  { %2577 = vmatprep.subr.bf16.mxu1 %v3094_v59  ;;  %2607 = vmatpush1.bf16.msra.mxu0 %v3006_v9 }
 0xbe5   :  { %2609 = vmatprep.subr.bf16.mxu0 %v3008_v10  ;;  %1799 = vmatprep.mubr.f32.mxu0 %v2896_v1 }
 0xbe6   :  { %1699 = vmatprep.mubr.f32.mxu1 %v2896_v1 }
 0xbe7   :  { %2579 = vmatpush1.bf16.msra.mxu1 %v3099_v0 }
 0xbe8   :  { %2581 = vmatprep.subr.bf16.mxu1 %v3102_v2  ;;  %2611 = vmatpush1.bf16.msra.mxu0 %v3024_v15 }
 0xbe9   :  { %2613 = vmatprep.subr.bf16.mxu0 %v3027_v16 }
 0xbeb   :  { %2583 = vmatpush1.bf16.msra.mxu1 %v3105_v8 }
 0xbec   :  { %2585 = vmatprep.subr.bf16.mxu1 %v3108_v11  ;;  %2615 = vmatpush1.bf16.msra.mxu0 %v3042_v21 }
 0xbed   :  { %2617 = vmatprep.subr.bf16.mxu0 %v3045_v22  ;;  %v1504_v22 = vld [vmem:[#allocation3 + $0x18] sm:$0xf] }
 0xbef   :  { %2587 = vmatpush1.bf16.msra.mxu1 %v3111_v18 }
 0xbf0   :  { %2589 = vmatprep.subr.bf16.mxu1 %v3114_v19  ;;  %2619 = vmatpush1.bf16.msra.mxu0 %v3054_v25 }
 0xbf1   :  { %2621 = vmatprep.subr.bf16.mxu0 %v3090_v54 }
 0xbf3   :  { %2591 = vmatpush1.bf16.msra.mxu1 %v3117_v27 }
 0xbf4   :  { %2593 = vmatprep.subr.bf16.mxu1 %v3120_v28 }
 0xbf7   :  { %2595 = vmatpush1.bf16.msra.mxu1 %v3123_v35 }
 0xbf8   :  { %2597 = vmatprep.subr.bf16.mxu1 %v3126_v36 }
 0xbfb   :  { %2599 = vmatpush1.bf16.msra.mxu1 %v3129_v41 }
 0xbfc   :  { %2601 = vmatprep.subr.bf16.mxu1 %v3132_v42 }
 0xbff   :  { %2603 = vmatpush1.bf16.msra.mxu1 %v3135_v47 }
 0xcb5   :  { %v1573_v9 = vpop.f32.mrb[10].mxu1 }
 0xcb6   :  { %v1473_v10 = vpop.f32.mrb[12].mxu0  ;;  %v1575_v15 = vpop.f32.mrb[11].mxu1 }
 0xcb7   :  { %v1580_v16 = vcombine.low %v1573_v9, %v1575_v15  ;;  %v1475_v21 = vpop.f32.mrb[13].mxu0  ;;  %v1474_v23 = vadd.f32 %v1473_v10, %v3188_v37 }
 0xcb8   :  { %v1476_v25 = vadd.f32 %v1475_v21, %v3184_v31 }
 0xcb9   :  { %v1587_v54 = vrot.slane %v1580_v16, %v3071_v32  ;;  %v2208_v29 = vmul.f32 -1.442695, %v1474_v23 }
 0xcba   :  { %v2209_v57 = vmul.f32 -1.442695, %v1476_v25 }
 0xcbb   :  { %v1589_v20 = vadd.f32 %v1587_v54, %v1504_v22 }
 0xcbc   :  { %2788 = vpow2.f32 %v2209_v57 }
 0xcbd   :  { %v2211_v26 = vmul.f32 -1.442695, %v1589_v20 }
 0xcbf   :  { %2790 = vpow2.f32 %v2211_v26 }
 0xcc0   :  { %2792 = vpow2.f32 %v2208_v29 }
 0xcc1   :  { %2794 = vtanh.f32 %v1589_v20 }
 0xcc6   :  { %v2789_v5 = vpop.eup %2788 }
 0xcc7   :  { %v1487_v3 = vadd.f32 1.0, %v2789_v5 }
 0xcc9   :  { %v2791_v33 = vpop.eup %2790 }
 0xcca   :  { %v1594_v53 = vadd.f32 1.0, %v2791_v33  ;;  %v2793_v38 = vpop.eup %2792 }
 0xccb   :  { %v1486_v39 = vadd.f32 1.0, %v2793_v38  ;;  %v2795_v40 = vpop.eup %2794 }
 0xccc   :  { %2796 = vrcp.f32 %v1594_v53  ;;  %v1604_v44 = vrot.slane %v2795_v40, %v3071_v32 }
 0xccd   :  { %2798 = vrcp.f32 %v1487_v3 }
 0xcce   :  { %2800 = vtanh.f32 %v1476_v25  ;;  %v1605_v52 = vcombine.high %v1604_v44, %v1604_v44 }
 0xccf   :  { %2802 = vrcp.f32 %v1486_v39 }
 0xcd6   :  { %v2797_v48 = vpop.eup %2796 }
 0xcd7   :  { %v1615_v50 = vrot.slane %v2797_v48, %v3071_v32  ;;  %v2799_v24 = vpop.eup %2798 }
 0xcd8   :  { %v2801_v49 = vpop.eup %2800 }
 0xcd9   :  { %v1616_v13 = vcombine.high %v1615_v50, %v1615_v50  ;;  %v1493_v56 = vsel %vm120_vm0, %v2801_v49, %v2799_v24  ;;  %v2803_v51 = vpop.eup %2802  ;;  %v1621_v61 = vmul.f32 %v1615_v50, %v3386_v45 }
 0xcda   :  { %v1495_v60 = vmul.f32 %v2803_v51, %v1493_v56  ;;  %v1494_v12 = vmul.f32 %v2803_v51, %v3391_v7 }
 0xcdb   :  { %v1620_v55 = vsel %vm120_vm0, %v1605_v52, %v1616_v13 }
 0xcdc   :  { %v1622_v46 = vmul.f32 %v1620_v55, %v1615_v50 }
 0xcde   :  { %1624 = vrot.lane.b32.xlu1 %v1622_v46, %s2891_s24 }
 0xce2   :  { %1497 = vrot.lane.b32.xlu1 %v1495_v60, %s2891_s24 }
 0xd50   :  { %v1625_v34 = vpop.permute.xlu1 %1624 }
 0xd51   :  { %v3433_v62 = vadd.f32 %v1625_v34, %v1621_v61 }
 0xd53   :  { %2804 = vtanh.f32 %v3433_v62 }
 0xd54   :  { %v1498_v6 = vpop.permute.xlu1 %1497 }
 0xd55   :  { %v3438_v14 = vadd.f32 %v1498_v6, %v1494_v12 }
 0xd57   :  { %2806 = vtanh.f32 %v3438_v14 }
 0xd5d   :  { %v2805_v63 = vpop.eup %2804 }
 0xd5e   :  { %v1629_v4 = vmul.f32 %v2805_v63, %v1620_v55 }
 0xd60   :  { %1631 = vrot.lane.b32.xlu0 %v1629_v4, %s2891_s24 }
 0xd61   :  { %v2807_v17 = vpop.eup %2806 }
 0xd62   :  { %v1502_v30 = vmul.f32 %v2807_v17, %v1493_v56 }
 0xdd2   :  { %v1632_v9 = vpop.permute.xlu0 %1631 }
 0xdd3   :  { %v1634_v45 = vsel %vm124_vm1, %v1632_v9, %v1502_v30  ;;  %2214 = vmatmul.mubr.msk.f32.vlgmr.msra.gmra.mrb[14].mxu0 %vm124_vm1, %v1632_v9 }
 0xdd4   :  { %1700 = vmatmul.mubr.f32.vlgmr.msra.gmra.mrb[12].mxu1 %v1634_v45  ;;  %2623 = vmatpush1.bf16.msra.mxu0 %v3092_v58 }
 0xdd5   :  { %2625 = vmatprep.subr.bf16.mxu0 %v3094_v59  ;;  %1927 = vmatprep.mubr.f32.mxu0 %v2896_v1 }
 0xdd6   :  { %2254 = vmatprep.mubr.msk.f32.mxu1 %vm2899_vm3, %v2896_v1 }
 0xdd8   :  { %2627 = vmatpush1.bf16.msra.mxu0 %v3099_v0 }
 0xdd9   :  { %2629 = vmatprep.subr.bf16.mxu0 %v3102_v2 }
 0xddc   :  { %2631 = vmatpush1.bf16.msra.mxu0 %v3105_v8 }
 0xddd   :  { %2633 = vmatprep.subr.bf16.mxu0 %v3108_v11 }
 0xde0   :  { %2635 = vmatpush1.bf16.msra.mxu0 %v3111_v18  ;;  %v1732_v18 = vld [vmem:[#allocation3 + $0x1c] sm:$0xf] }
 0xde1   :  { %2637 = vmatprep.subr.bf16.mxu0 %v3114_v19 }
 0xde4   :  { %2639 = vmatpush1.bf16.msra.mxu0 %v3117_v27 }
 0xde5   :  { %2641 = vmatprep.subr.bf16.mxu0 %v3120_v28 }
 0xde8   :  { %2643 = vmatpush1.bf16.msra.mxu0 %v3123_v35 }
 0xde9   :  { %2645 = vmatprep.subr.bf16.mxu0 %v3126_v36 }
 0xdec   :  { %2647 = vmatpush1.bf16.msra.mxu0 %v3129_v41 }
 0xded   :  { %2649 = vmatprep.subr.bf16.mxu0 %v3132_v42 }
 0xdf0   :  { %2651 = vmatpush1.bf16.msra.mxu0 %v3135_v47 }
 0xea6   :  { %v1801_v58 = vpop.f32.mrb[14].mxu0 }
 0xea7   :  { %v1701_v59 = vpop.f32.mrb[12].mxu1  ;;  %v1803_v0 = vpop.f32.mrb[15].mxu0 }
 0xea8   :  { %v1702_v2 = vadd.f32 %v1701_v59, %v3188_v37  ;;  %v1808_v8 = vcombine.low %v1801_v58, %v1803_v0  ;;  %v1703_v11 = vpop.f32.mrb[13].mxu1 }
 0xea9   :  { %v1704_v19 = vadd.f32 %v1703_v11, %v3184_v31 }
 0xeaa   :  { %v2212_v27 = vmul.f32 -1.442695, %v1702_v2  ;;  %v1815_v28 = vrot.slane %v1808_v8, %v3071_v32 }
 0xeab   :  { %v2213_v35 = vmul.f32 -1.442695, %v1704_v19 }
 0xeac   :  { %2808 = vpow2.f32 %v2212_v27  ;;  %v1817_v36 = vadd.f32 %v1815_v28, %v1732_v18 }
 0xead   :  { %2810 = vpow2.f32 %v2213_v35  ;;  %v2219_v35 = vld [vmem:[%s3542_s5] ss:$0 sm:$0xff] }
 0xeae   :  { %v2215_v41 = vmul.f32 -1.442695, %v1817_v36 }
 0xeb0   :  { %2812 = vpow2.f32 %v2215_v41  ;;  %v2003_v41 = vld [vmem:[%s3543_s6 + $0x8] sm:$0xff] }
 0xeb1   :  { %2814 = vtanh.f32 %v1704_v19 }
 0xeb2   :  { %2816 = vtanh.f32 %v1817_v36  ;;  %v2002_v36 = vld [vmem:[%s3543_s6] sm:$0xff] }
 0xeb6   :  { %v2809_v42 = vpop.eup %2808 }
 0xeb7   :  { %v2811_v47 = vpop.eup %2810  ;;  %v1714_v7 = vadd.f32 1.0, %v2809_v42  ;;  %v2004_v42 = vld [vmem:[%s3543_s6 + $0x10] sm:$0xff] }
 0xeb8   :  { %v1715_v10 = vadd.f32 1.0, %v2811_v47  ;;  %v2898_v47 = vmov 0.0|0.0  }
 0xeb9   :  { %2652 = vmatprep.subr.bf16.mxu1 %v2898_v47 }
 0xeba   :  { %v2813_v15 = vpop.eup %2812  ;;  %2818 = vrcp.f32 %v1715_v10  ;;  %v2005_v10 = vld [vmem:[%s3543_s6 + $0x18] sm:$0xff] }
 0xebb   :  { %2820 = vrcp.f32 %v1714_v7  ;;  %v1822_v16 = vadd.f32 1.0, %v2813_v15  ;;  %v2815_v21 = vpop.eup %2814  ;;  %v2653_v7 = vpack.c.bf16 %v2003_v41, %v2002_v36  ;;  %v2656_v15 = vpack.c.bf16 %v2005_v10, %v2004_v42 }
 0xebc   :  { %v2817_v22 = vpop.eup %2816 }
 0xebd   :  { %2822 = vrcp.f32 %v1822_v16  ;;  %v1832_v23 = vrot.slane %v2817_v22, %v3071_v32  ;;  %2654 = vmatpush3.bf16.msra.mxu1 %v2653_v7  ;;  %v2006_v16 = vld [vmem:[%s3543_s6 + $0x20] sm:$0xff] }
 0xebe   :  { %2655 = vmatprep.subr.bf16.mxu1 %v2898_v47 }
 0xebf   :  { %v1833_v5 = vcombine.high %v1832_v23, %v1832_v23 }
 0xec1   :  { %2657 = vmatpush3.bf16.msra.mxu1 %v2656_v15 }
 0xec2   :  { %2658 = vmatprep.subr.bf16.mxu1 %v2898_v47 }
 0xec4   :  { %v2819_v25 = vpop.eup %2818 }
 0xec5   :  { %v2821_v54 = vpop.eup %2820  ;;  %v1721_v57 = vsel %vm120_vm0, %v2815_v21, %v2819_v25  ;;  %v2007_v21 = vld [vmem:[%s3543_s6 + $0x28] sm:$0xff]  ;;  %v2008_v25 = vld [vmem:[%s3543_s6 + $0x30] sm:$0xff] }
 0xec6   :  { %v1723_v20 = vmul.f32 %v2821_v54, %v1721_v57  ;;  %v2659_v22 = vpack.c.bf16 %v2007_v21, %v2006_v16 }
 0xec7   :  { %v2823_v26 = vpop.eup %2822 }
 0xec8   :  { %1725 = vrot.lane.b32.xlu1 %v1723_v20, %s2891_s24  ;;  %v1843_v29 = vrot.slane %v2823_v26, %v3071_v32  ;;  %v1722_v32 = vmul.f32 %v2821_v54, %v3438_v14  ;;  %v2009_v54 = vld [vmem:[%s3543_s6 + $0x38] sm:$0xff]  ;;  %2660 = vmatpush3.bf16.msra.mxu1 %v2659_v22 }
 0xec9   :  { %2661 = vmatprep.subr.bf16.mxu1 %v2898_v47 }
 0xeca   :  { %v1844_v33 = vcombine.high %v1843_v29, %v1843_v29  ;;  %v1849_v38 = vmul.f32 %v1843_v29, %v3433_v62 }
 0xecc   :  { %v1848_v53 = vsel %vm120_vm0, %v1833_v5, %v1844_v33 }
 0xecd   :  { %v1850_v3 = vmul.f32 %v1848_v53, %v1843_v29 }
 0xecf   :  { %1852 = vrot.lane.b32.xlu0 %v1850_v3, %s2891_s24 }
 0xf3a   :  { %v1726_v50 = vpop.permute.xlu1 %1725 }
 0xf3b   :  { %v1728_v52 = vadd.f32 %v1726_v50, %v1722_v32  ;;  %v2095_v50 = vld [vmem:[%s3545_s8 + $0x10] sm:$0xff]  ;;  %v2096_v32 = vld [vmem:[%s3545_s8 + $0x18] sm:$0xff] }
 0xf41   :  { %v1853_v39 = vpop.permute.xlu0 %1852 }
 0xf42   :  { %v1855_v40 = vadd.f32 %v1853_v39, %v1849_v38  ;;  %v2093_v39 = vld [vmem:[%s3545_s8] sm:$0xff] }
 0xf44   :  { %2824 = vtanh.f32 %v1855_v40  ;;  %v2094_v40 = vld [vmem:[%s3545_s8 + $0x8] sm:$0xff] }
 0xf45   :  { %2826 = vtanh.f32 %v1728_v52 }
 0xf4e   :  { %v2825_v44 = vpop.eup %2824 }
 0xf4f   :  { %v1857_v48 = vmul.f32 %v2825_v44, %v1848_v53  ;;  %v2827_v13 = vpop.eup %2826  ;;  %v2665_v44 = vpack.c.bf16 %v2094_v40, %v2093_v39 }
 0xf50   :  { %v1730_v24 = vmul.f32 %v2827_v13, %v1721_v57  ;;  %v2662_v57 = vpack.c.bf16 %v2009_v54, %v2008_v25  ;;  %v2220_v13 = vld [vmem:[%s3544_s7] ss:$0 sm:$0xff] }
 0xf51   :  { %1859 = vrot.lane.b32.xlu0 %v1857_v48, %s2891_s24 }
 0xf52   :  { %2663 = vmatpush3.bf16.msra.mxu1 %v2662_v57 }
 0xf53   :  { %2664 = vmatprep.subr.bf16.mxu1 %v2898_v47 }
 0xfc3   :  { %v1860_v55 = vpop.permute.xlu0 %1859 }
 0xfc4   :  { %v1862_v49 = vsel %vm124_vm1, %v1860_v55, %v1730_v24 }
 0xfc5   :  { %1928 = vmatmul.mubr.f32.vlgmr.msra.gmra.mrb[16].mxu0 %v1862_v49 }
0x1098   :  { %v1929_v46 = vpop.f32.mrb[16].mxu0 }
0x1099   :  { %v1930_v56 = vadd.f32 %v1929_v46, %v3188_v37  ;;  %v1931_v51 = vpop.f32.mrb[17].mxu0  ;;  %v2222_v46 = vld [vmem:[#allocation2] ss:$0 sm:$0xff] }
0x109a   :  { %v1932_v60 = vadd.f32 %v1931_v51, %v3184_v31 }
0x109b   :  { %v2216_v61 = vmul.f32 -1.442695, %v1930_v56 }
0x109c   :  { %v2217_v34 = vmul.f32 -1.442695, %v1932_v60 }
0x109d   :  { %2828 = vpow2.f32 %v2216_v61 }
0x109e   :  { %2830 = vpow2.f32 %v2217_v34 }
0x109f   :  { %2832 = vtanh.f32 %v1932_v60 }
0x10a7   :  { %v2829_v62 = vpop.eup %2828 }
0x10a8   :  { %v2831_v63 = vpop.eup %2830  ;;  %v1942_v4 = vadd.f32 1.0, %v2829_v62 }
0x10a9   :  { %v1943_v6 = vadd.f32 1.0, %v2831_v63  ;;  %v2833_v12 = vpop.eup %2832 }
0x10ab   :  { %2834 = vrcp.f32 %v1943_v6 }
0x10ac   :  { %2836 = vrcp.f32 %v1942_v4 }
0x10b5   :  { %v2835_v14 = vpop.eup %2834 }
0x10b6   :  { %v2837_v17 = vpop.eup %2836  ;;  %v1949_v37 = vsel %vm120_vm0, %v2833_v12, %v2835_v14 }
0x10b7   :  { %v1951_v30 = vmul.f32 %v2837_v17, %v1949_v37  ;;  %v1950_v31 = vmul.f32 %v2837_v17, %v1728_v52  ;;  %v2668_v52 = vpack.c.bf16 %v2096_v32, %v2095_v50 }
0x10b9   :  { %1953 = vrot.lane.b32.xlu1 %v1951_v30, %s2891_s24 }
0x112b   :  { %v1954_v9 = vpop.permute.xlu1 %1953 }
0x112c   :  { %v1956_v45 = vadd.f32 %v1954_v9, %v1950_v31 }
0x112e   :  { %2838 = vtanh.f32 %v1956_v45 }
0x1138   :  { %v2839_v58 = vpop.eup %2838 }
0x1139   :  { %v1958_v59 = vmul.f32 %v2839_v58, %v1949_v37 }
0x113b   :  { %1960 = vrot.lane.b32.xlu0 %v1958_v59, %s2891_s24 }
0x11ad   :  { %v1961_v0 = vpop.permute.xlu0 %1960 }
0x11ae   :  { %v1964_v2 = vsel %vm1963_vm2, %v1961_v0, 0.0 }
0x11af   :  { %1965 = vadd.xlane.f32.xlu1 %v1964_v2 }
0x11c0   :  { %1988 = vrot.lane.b32.xlu1 %v2218_v43, %s2891_s24 }
0x123c   :  { %v1966_v8 = vpop.xlane.xlu1 %1965 }
0x123d   :  { %v1968_v11 = vmul.f32 0.015625, %v1966_v8 }
0x123f   :  { %v1969_v18 = vsub.f32 %v1958_v59, %v1968_v11 }
0x1240   :  { %v1989_v5 = vpop.permute.xlu1 %1988 }
0x1241   :  { %v1970_v19 = vmul.f32 %v1969_v18, %v1969_v18 }
0x1243   :  { %1972 = vrot.lane.b32.xlu0 %v1970_v19, %s2891_s24 }
0x12b5   :  { %v1973_v27 = vpop.permute.xlu0 %1972 }
0x12b6   :  { %v1975_v28 = vsel %vm1963_vm2, %v1973_v27, 0.0 }
0x12b7   :  { %1976 = vadd.xlane.f32.xlu0 %v1975_v28 }
0x12cd   :  { %1998 = vrot.lane.b32.xlu0 %v2219_v35, %s2891_s24 }
0x1344   :  { %v1977_v20 = vpop.xlane.xlu0 %1976 }
0x1345   :  { %v1978_v23 = vmul.f32 0.015625, %v1977_v20 }
0x1347   :  { %v1979_v26 = vadd.f32 1e-05, %v1978_v23 }
0x1348   :  { %v1999_v53 = vpop.permute.xlu0 %1998 }
0x1349   :  { %2840 = vrsqrt.f32 %v1979_v26 }
0x1353   :  { %v2841_v29 = vpop.eup %2840 }
0x1354   :  { %v1981_v33 = vmul.f32 %v2841_v29, %v1969_v18 }
0x1356   :  { %v1991_v3 = vmul.f32 %v1989_v5, %v1981_v33 }
0x1358   :  { %v2001_v38 = vadd.f32 %v1999_v53, %v1991_v3 }
0x135a   :  { %2018 = vrot.lane.b32.xlu1 %v2001_v38, %s2891_s24 }
0x13cc   :  { %v2019_v48 = vpop.permute.xlu1 %2018 }
0x13cd   :  { %2255 = vmatmul.mubr.msk.f32.vlgmr.msra.gmra.mrb[14].mxu1 %vm124_vm1, %v2019_v48 }
0x13ce   :  { %2666 = vmatpush3.bf16.msra.mxu1 %v2665_v44  ;;  %2265 = vmatprep.mubr.msk.f32.mxu1 %vm2899_vm3, %v2896_v1 }
0x13cf   :  { %2667 = vmatprep.subr.bf16.mxu1 %v2898_v47 }
0x13d2   :  { %2669 = vmatpush3.bf16.msra.mxu1 %v2668_v52 }
0x14a0   :  { %v2088_v24 = vpop.f32.mrb[14].mxu1 }
0x14a1   :  { %v2089_v55 = vadd.f32 %v2220_v13, %v2088_v24  ;;  %v2256_v49 = vpop.f32.mrb[15].mxu1 }
0x14a3   :  { %v2092_v1 = vmax.f32 %v2089_v55, 0.0 }
0x14a5   :  { %2266 = vmatmul.mubr.msk.f32.vlgmr.msra.gmra.mrb[16].mxu1 %vm2104_vm4, %v2092_v1 }
0x1578   :  { %v2174_v56 = vpop.f32.mrb[16].mxu1 }
0x1579   :  { %v2175_v51 = vadd.f32 %v2222_v46, %v2174_v56  ;;  %v2267_v60 = vpop.f32.mrb[17].mxu1 }
0x157b   :  { %2179 = vst.msk [vmem:[%s3547_s10] sm:$0x3] %vm2178_vm5, %v2175_v51 }
0x157c   :  { %2184 = vsyncpa [#allocation4], 1 }
0x157d   :  { %2185 = vsyncpa [#allocation6], 1 }

</bundles_post_ra>
